<compile_context>
chip_gen: v6e
topology: v6e:2x2x1
jax: 0.10.0
libtpu: 0.0.40
codegen_flags: <defaults>
</compile_context>

<pallas_src>
import functools

import jax
import jax.numpy as jnp
from jax.experimental import pallas as pl
from jax.experimental.pallas import tpu as pltpu


_ACT_DTYPE = jnp.bfloat16          # inter-layer activations / matmul operands


def _vmem_limit_bytes():
    """Per-generation scoped VMEM budget.

    v5e/v6e (128 MiB physical) -> 96 MiB, v7x (64 MiB physical) -> 48 MiB.
    Falls back to the conservative v7x budget if the query is unavailable.
    """
    try:
        phys = int(pltpu.get_tpu_info().vmem_capacity_bytes)
    except Exception:  # pragma: no cover - query not available
        phys = 64 * 1024 * 1024
    if phys < 32 * 1024 * 1024:
        phys = 64 * 1024 * 1024
    return min(phys * 3 // 4, 96 * 1024 * 1024)


_VMEM_LIMIT = _vmem_limit_bytes()
_TILE_BUDGET = _VMEM_LIMIT // 3      # per-call working-set budget


def _round_down(x, m):
    return (x // m) * m


def _pick_tile_m(m, row_bytes, fixed_bytes=0):
    """Largest M-tile (<=1024) that fits the per-call VMEM budget.

    row_bytes must include double-buffered input/output/residual rows plus the
    f32 epilogue intermediate; fixed_bytes covers weights/bias.  Tiles are
    aligned to 256 (else 128 / 8) and masked edge blocks are accepted instead
    of searching for exact divisors of M.
    """
    row_bytes = max(int(row_bytes), 1)
    avail = max(_TILE_BUDGET - int(fixed_bytes), 8 * row_bytes)
    cap = min(max(8, avail // row_bytes), 1024)
    if m <= cap:
        return m
    for align in (256, 128, 8):
        if cap >= align:
            return _round_down(cap, align)
    return 8


# ---------------------------------------------------------------------------
# Pallas kernels
# ---------------------------------------------------------------------------

def _matmul_bias_kernel(a_ref, w_ref, b_ref, o_ref, *, relu):
    # a: (tm, K) bf16, w: (K, tn) bf16, b: (1, tn) f32
    y = jnp.dot(a_ref[...], w_ref[...], preferred_element_type=jnp.float32)
    y = y + b_ref[...]
    if relu:
        y = jnp.maximum(y, 0.0)
    o_ref[...] = y.astype(o_ref.dtype)


def _matmul_bias_res_kernel(a_ref, w_ref, b_ref, r_ref, o_ref, *, relu):
    y = jnp.dot(a_ref[...], w_ref[...], preferred_element_type=jnp.float32)
    y = y + b_ref[...] + r_ref[...].astype(jnp.float32)
    if relu:
        y = jnp.maximum(y, 0.0)
    o_ref[...] = y.astype(o_ref.dtype)


def _conv_taps_kernel(a_ref, w_ref, b_ref, o_ref, acc_ref, *, ntaps, relu):
    # a: (1, tm, Cin) -- one tap slab per grid step (axis 1).
    # w: (ntaps, Cin, Cout) -- full weight, VMEM-resident across the grid.
    t = pl.program_id(1)

    @pl.when(t == 0)
    def _():
        acc_ref[...] = jnp.zeros_like(acc_ref)

    acc_ref[...] += jnp.dot(a_ref[0], w_ref[t],
                            preferred_element_type=jnp.float32)

    @pl.when(t == ntaps - 1)
    def _():
        y = acc_ref[...] + b_ref[...]
        if relu:
            y = jnp.maximum(y, 0.0)
        o_ref[...] = y.astype(o_ref.dtype)


def _maxpool_kernel(p_ref, o_ref):
    # Running max over the taps grid axis; the output block (constant index
    # across taps) is the accumulator.
    t = pl.program_id(1)

    @pl.when(t == 0)
    def _():
        o_ref[...] = p_ref[0]

    @pl.when(t > 0)
    def _():
        o_ref[...] = jnp.maximum(o_ref[...], p_ref[0])


def _pool_linear_kernel(x_ref, w_ref, b_ref, o_ref, *, inv_hw):
    # x: (nb, H*W, C) -> mean over spatial axis -> Linear
    feats = jnp.sum(x_ref[...].astype(jnp.float32), axis=1) * inv_hw
    y = jnp.dot(feats, w_ref[...], preferred_element_type=jnp.float32)
    o_ref[...] = (y + b_ref[...]).astype(o_ref.dtype)


# ---------------------------------------------------------------------------
# Tiled pallas_call wrappers
# ---------------------------------------------------------------------------

def _tiled_matmul_bias(a, w, bias, *, relu, residual=None, out_dtype=_ACT_DTYPE):
    m, k = a.shape
    cout = w.shape[1]
    tn = cout if cout <= 512 else 512           # Cout tiling (v7x 2nd core)

    a_isz = jnp.dtype(a.dtype).itemsize
    w_isz = jnp.dtype(w.dtype).itemsize
    o_isz = jnp.dtype(out_dtype).itemsize
    # double-buffered a / out (+residual) blocks + single f32 epilogue temp
    row_bytes = 2 * k * a_isz + 2 * tn * o_isz + tn * 4
    if residual is not None:
        row_bytes += 2 * tn * jnp.dtype(residual.dtype).itemsize
    fixed = 2 * k * tn * w_isz + 2 * tn * 4
    tm = _pick_tile_m(m, row_bytes, fixed)

    grid = (pl.cdiv(m, tm), pl.cdiv(cout, tn))
    a_spec = pl.BlockSpec((tm, k), lambda i, j: (i, 0))
    w_spec = pl.BlockSpec((k, tn), lambda i, j: (0, j))
    b_spec = pl.BlockSpec((1, tn), lambda i, j: (0, j))
    o_spec = pl.BlockSpec((tm, tn), lambda i, j: (i, j))
    cp = pltpu.CompilerParams(dimension_semantics=("parallel", "parallel"),
                              vmem_limit_bytes=_VMEM_LIMIT)
    bytes_accessed = (m * k * a_isz + k * cout * w_isz + m * cout * o_isz
                      + (m * cout * a_isz if residual is not None else 0))
    ce = pl.CostEstimate(flops=2 * m * k * cout, transcendentals=0,
                         bytes_accessed=int(bytes_accessed))
    out_shape = jax.ShapeDtypeStruct((m, cout), out_dtype)

    if residual is None:
        kern = functools.partial(_matmul_bias_kernel, relu=relu)
        return pl.pallas_call(kern, out_shape=out_shape, grid=grid,
                              in_specs=[a_spec, w_spec, b_spec],
                              out_specs=o_spec, compiler_params=cp,
                              cost_estimate=ce)(a, w, bias)

    r_spec = pl.BlockSpec((tm, tn), lambda i, j: (i, j))
    kern = functools.partial(_matmul_bias_res_kernel, relu=relu)
    return pl.pallas_call(kern, out_shape=out_shape, grid=grid,
                          in_specs=[a_spec, w_spec, b_spec, r_spec],
                          out_specs=o_spec, compiler_params=cp,
                          cost_estimate=ce)(a, w, bias, residual)


def _tiled_conv_taps(a, w, bias, *, relu, out_dtype=_ACT_DTYPE):
    """a: (T, M, Cin) per-tap slabs, w: (T, Cin, Cout), bias: (1, Cout)."""
    ntaps, m, cin = a.shape
    cout = w.shape[2]
    a_isz = jnp.dtype(a.dtype).itemsize
    w_isz = jnp.dtype(w.dtype).itemsize
    o_isz = jnp.dtype(out_dtype).itemsize
    row_bytes = 2 * cin * a_isz + 2 * cout * o_isz + 2 * cout * 4
    fixed = 2 * ntaps * cin * cout * w_isz + 2 * cout * 4
    tm = _pick_tile_m(m, row_bytes, fixed)
    grid = (pl.cdiv(m, tm), ntaps)              # reduction (taps) axis last

    ce = pl.CostEstimate(
        flops=2 * m * ntaps * cin * cout, transcendentals=0,
        bytes_accessed=int(ntaps * m * cin * a_isz
                           + ntaps * cin * cout * w_isz
                           + m * cout * o_isz))
    kern = functools.partial(_conv_taps_kernel, ntaps=ntaps, relu=relu)
    return pl.pallas_call(
        kern,
        out_shape=jax.ShapeDtypeStruct((m, cout), out_dtype),
        grid=grid,
        in_specs=[pl.BlockSpec((1, tm, cin), lambda i, t: (t, i, 0)),
                  # full weight, constant index -> DMA'd once, VMEM-resident
                  pl.BlockSpec((ntaps, cin, cout), lambda i, t: (0, 0, 0)),
                  pl.BlockSpec((1, cout), lambda i, t: (0, 0))],
        out_specs=pl.BlockSpec((tm, cout), lambda i, t: (i, 0)),
        scratch_shapes=[pltpu.VMEM((tm, cout), jnp.float32)],
        compiler_params=pltpu.CompilerParams(
            dimension_semantics=("parallel", "arbitrary"),
            vmem_limit_bytes=_VMEM_LIMIT),
        cost_estimate=ce,
    )(a, w, bias)


# ---------------------------------------------------------------------------
# Glue (slab extraction / reshapes stay in plain JAX)
# ---------------------------------------------------------------------------

def _shifted_slabs(x, kh, kw, stride, pad, pad_value=0.0):
    """x: (N,H,W,C) -> list of kh*kw shifted slabs, each (N,Ho,Wo,C)."""
    if pad:
        x = jnp.pad(x, ((0, 0), (pad, pad), (pad, pad), (0, 0)),
                    constant_values=pad_value)
    n, h, w, _ = x.shape
    ho = (h - kh) // stride + 1
    wo = (w - kw) // stride + 1
    slabs = [x[:, i:i + stride * ho:stride, j:j + stride * wo:stride, :]
             for i in range(kh) for j in range(kw)]
    return slabs, (n, ho, wo)


def conv_bn(x, w_hwio, scale, bias, *, stride=1, pad=0, relu=True,
            residual=None):
    """conv(no bias) + BN(eval, scale folded into weights) [+res] [+ReLU]."""
    kh, kw, cin, cout = w_hwio.shape
    # Fold BN scale into the conv weights (host side, f32), cast to bf16.
    w = (w_hwio.astype(jnp.float32) *
         scale.reshape(1, 1, 1, cout).astype(jnp.float32)).astype(_ACT_DTYPE)
    b = bias.reshape(1, cout).astype(jnp.float32)

    if kh == 1 and kw == 1:
        # 1x1 conv: no im2col at all, just a (strided) view -> tiled matmul.
        if stride != 1:
            x = x[:, ::stride, ::stride, :]
        n, ho, wo, _ = x.shape
        m = n * ho * wo
        a = x.reshape(m, cin)
        res = None if residual is None else residual.reshape(m, cout)
        y = _tiled_matmul_bias(a, w.reshape(cin, cout), b, relu=relu,
                               residual=res)
        return y.reshape(n, ho, wo, cout)

    slabs, (n, ho, wo) = _shifted_slabs(x, kh, kw, stride, pad)
    m = n * ho * wo

    if cin <= 256:
        # Fused-K im2col (K = kh*kw*Cin): fills the 256-deep MXU; covers the
        # stem and the layer1/layer2/layer3 3x3 convs (raised threshold).
        a = jnp.concatenate([s.reshape(m, cin) for s in slabs], axis=1)
        res = None if residual is None else residual.reshape(m, cout)
        y = _tiled_matmul_bias(a, w.reshape(kh * kw * cin, cout), b,
                               relu=relu, residual=res)
    else:
        # Cin = 512 (layer4): per-tap accumulation grid with the full weight
        # tensor resident in VMEM.
        assert residual is None
        a = jnp.stack([s.reshape(m, cin) for s in slabs], axis=0)  # (T, M, Cin)
        y = _tiled_conv_taps(a, w.reshape(kh * kw, cin, cout), b, relu=relu)
    return y.reshape(n, ho, wo, cout)


def max_pool_3x3_s2(x):
    c = x.shape[-1]
    neg = jnp.finfo(x.dtype).min
    slabs, (n, ho, wo) = _shifted_slabs(x, 3, 3, stride=2, pad=1,
                                        pad_value=neg)
    m = n * ho * wo
    a = jnp.stack([s.reshape(m, c) for s in slabs], axis=0)   # (9, M, C)
    isz = jnp.dtype(x.dtype).itemsize
    tm = _pick_tile_m(m, 4 * c * isz)          # one streamed slab per step
    return pl.pallas_call(
        _maxpool_kernel,
        out_shape=jax.ShapeDtypeStruct((m, c), x.dtype),
        grid=(pl.cdiv(m, tm), 9),
        in_specs=[pl.BlockSpec((1, tm, c), lambda i, t: (t, i, 0))],
        out_specs=pl.BlockSpec((tm, c), lambda i, t: (i, 0)),
        compiler_params=pltpu.CompilerParams(
            dimension_semantics=("parallel", "arbitrary"),
            vmem_limit_bytes=_VMEM_LIMIT),
    )(a).reshape(n, ho, wo, c)


def global_pool_linear(x, w_oi, b):
    """AdaptiveAvgPool2d((1,1)) + flatten + Linear, tiled over the batch."""
    n, h, w, c = x.shape
    e = w_oi.shape[0]
    hw = h * w
    xr = x.reshape(n, hw, c)

    isz = jnp.dtype(x.dtype).itemsize
    per_image = 2 * hw * c * isz + 2 * e * 4 + c * 4
    fixed = 2 * c * e * 4 + 2 * e * 4
    nb = max(1, min(n, (_TILE_BUDGET - fixed) // max(per_image, 1)))
    if nb < n:                                   # keep 2D output block 8-aligned
        nb = min(n, max(8, _round_down(nb, 8)))

    kern = functools.partial(_pool_linear_kernel, inv_hw=1.0 / hw)
    return pl.pallas_call(
        kern,
        out_shape=jax.ShapeDtypeStruct((n, e), jnp.float32),
        grid=(pl.cdiv(n, nb),),
        in_specs=[pl.BlockSpec((nb, hw, c), lambda i: (i, 0, 0)),
                  pl.BlockSpec((c, e), lambda i: (0, 0)),
                  pl.BlockSpec((1, e), lambda i: (0, 0))],
        out_specs=pl.BlockSpec((nb, e), lambda i: (i, 0)),
        compiler_params=pltpu.CompilerParams(
            dimension_semantics=("arbitrary",),
            vmem_limit_bytes=_VMEM_LIMIT),
    )(xr, w_oi.T.astype(jnp.float32), b.reshape(1, e).astype(jnp.float32))


# ---------------------------------------------------------------------------
# Deterministic synthetic ResNet50 + embed parameters
# ---------------------------------------------------------------------------

_BN_EPS = 1e-5


def _conv_init(key, kh, kw, cin, cout):
    fan_in = kh * kw * cin
    std = (2.0 / fan_in) ** 0.5
    return jax.random.normal(key, (kh, kw, cin, cout), jnp.float32) * std


def _bn_init(key, c):
    k1, k2 = jax.random.split(key)
    gamma = 1.0 + 0.1 * jax.random.normal(k1, (c,), jnp.float32)
    beta = 0.1 * jax.random.normal(k2, (c,), jnp.float32)
    running_mean = jnp.zeros((c,), jnp.float32)
    running_var = jnp.ones((c,), jnp.float32)
    scale = gamma / jnp.sqrt(running_var + _BN_EPS)
    bias = beta - running_mean * scale
    return scale, bias


def init_encoder_params(key, embed_size):
    keys = iter(jax.random.split(key, 1024))
    nk = lambda: next(keys)

    params = {}
    params["conv1"] = _conv_init(nk(), 7, 7, 3, 64)
    params["bn1"] = _bn_init(nk(), 64)

    layer_cfg = [(3, 64, 256, 1), (4, 128, 512, 2),
                 (6, 256, 1024, 2), (3, 512, 2048, 2)]
    in_c = 64
    layers = []
    for nblocks, mid, out_c, stride in layer_cfg:
        blocks = []
        for bidx in range(nblocks):
            s = stride if bidx == 0 else 1
            blk = {
                "conv1": _conv_init(nk(), 1, 1, in_c, mid),
                "bn1": _bn_init(nk(), mid),
                "conv2": _conv_init(nk(), 3, 3, mid, mid),
                "bn2": _bn_init(nk(), mid),
                "conv3": _conv_init(nk(), 1, 1, mid, out_c),
                "bn3": _bn_init(nk(), out_c),
                "stride": s,
            }
            if bidx == 0:
                blk["down_conv"] = _conv_init(nk(), 1, 1, in_c, out_c)
                blk["down_bn"] = _bn_init(nk(), out_c)
            blocks.append(blk)
            in_c = out_c
        layers.append(blocks)
    params["layers"] = layers

    fc_in = 2048  # resnet50.fc.in_features
    bound = 1.0 / (fc_in ** 0.5)
    params["embed_w"] = jax.random.uniform(
        nk(), (embed_size, fc_in), jnp.float32, -bound, bound)
    params["embed_b"] = jax.random.uniform(
        nk(), (embed_size,), jnp.float32, -bound, bound)
    return params


# ---------------------------------------------------------------------------
# Forward pass (EncoderCNN.forward)
# ---------------------------------------------------------------------------

def encoder_cnn_forward(params, images_nchw):
    # NCHW (PyTorch) -> NHWC (kernel layout), bf16 activations
    x = jnp.transpose(images_nchw, (0, 2, 3, 1)).astype(_ACT_DTYPE)

    # stem: pad Cin 3 -> 4 (zero channel + zero weight rows) for aligned K.
    x = jnp.pad(x, ((0, 0), (0, 0), (0, 0), (0, 1)))
    w1 = jnp.pad(params["conv1"], ((0, 0), (0, 0), (0, 1), (0, 0)))
    x = conv_bn(x, w1, *params["bn1"], stride=2, pad=3, relu=True)
    x = max_pool_3x3_s2(x)

    # bottleneck stages (torchvision resnet50 v1.5: stride in the 3x3 conv)
    for blocks in params["layers"]:
        for blk in blocks:
            identity = x
            s = blk["stride"]
            y = conv_bn(x, blk["conv1"], *blk["bn1"], stride=1, pad=0,
                        relu=True)
            y = conv_bn(y, blk["conv2"], *blk["bn2"], stride=s, pad=1,
                        relu=True)
            if "down_conv" in blk:
                identity = conv_bn(x, blk["down_conv"], *blk["down_bn"],
                                   stride=s, pad=0, relu=False)
            x = conv_bn(y, blk["conv3"], *blk["bn3"], stride=1, pad=0,
                        relu=True, residual=identity)

    # AdaptiveAvgPool2d((1,1)) + flatten + Linear(2048, embed_size), fused.
    return global_pool_linear(x, params["embed_w"], params["embed_b"])


if __name__ == "__main__":
    key = jax.random.PRNGKey(0)
    pkey, xkey = jax.random.split(key)

    embed_size = 32
    params = init_encoder_params(pkey, embed_size)

    # Smallest spatial size that survives resnet50's /32 downsampling cleanly.
    images = jax.random.normal(xkey, (2, 3, 64, 64), jnp.float32)  # NCHW

    out = encoder_cnn_forward(params, images)
    out = jax.block_until_ready(out)
    assert out.shape == (2, embed_size), out.shape
    assert out.dtype == jnp.float32
    print("KERNEL_OK")
</pallas_src>

<mosaic_0001>
module attributes {stable_mosaic.version = 11 : i64} {
  func.func @_matmul_bias_kernel(%arg0: i32, %arg1: i32, %arg2: memref<1024x196xbf16, #tpu.memory_space<vmem>>, %arg3: memref<196x64xbf16, #tpu.memory_space<vmem>>, %arg4: memref<1x64xf32, #tpu.memory_space<vmem>>, %arg5: memref<1024x64xbf16, #tpu.memory_space<vmem>>) attributes {dimension_semantics = [#tpu.dimension_semantics<parallel>, #tpu.dimension_semantics<parallel>], iteration_bounds = array<i64: 2, 1>, scalar_prefetch = 0 : i64, scratch_operands = 0 : i64, tpu.core_type = #tpu.core_type<tc>, window_params = [{transform_indices = @transform_0, window_bounds = array<i64: 1024, 196>}, {transform_indices = @transform_1, window_bounds = array<i64: 196, 64>}, {transform_indices = @transform_2, window_bounds = array<i64: 1, 64>}, {transform_indices = @transform_3, window_bounds = array<i64: 1024, 64>}]} {
    %c0 = arith.constant 0 : index
    %c0_0 = arith.constant 0 : index
    %0 = vector.load %arg2[%c0, %c0_0] : memref<1024x196xbf16, #tpu.memory_space<vmem>>, vector<1024x196xbf16>
    %c0_1 = arith.constant 0 : index
    %c0_2 = arith.constant 0 : index
    %1 = vector.load %arg3[%c0_1, %c0_2] : memref<196x64xbf16, #tpu.memory_space<vmem>>, vector<196x64xbf16>
    %cst = arith.constant dense<0.000000e+00> : vector<1024x64xf32>
    %2 = tpu.matmul %0, %1, %cst {dimension_numbers = #tpu.dot_dimension_numbers<[1], [0], [0], [1], [0, 0, 1, 1], [], []>} : vector<1024x196xbf16>, vector<196x64xbf16>, vector<1024x64xf32> -> vector<1024x64xf32>
    %c0_3 = arith.constant 0 : index
    %c0_4 = arith.constant 0 : index
    %3 = vector.load %arg4[%c0_3, %c0_4] : memref<1x64xf32, #tpu.memory_space<vmem>>, vector<1x64xf32>
    %4 = vector.broadcast %3 : vector<1x64xf32> to vector<1024x64xf32>
    %5 = arith.addf %2, %4 : vector<1024x64xf32>
    %cst_5 = arith.constant 0.000000e+00 : f32
    %6 = vector.broadcast %cst_5 : f32 to vector<1024x64xf32>
    %7 = arith.maximumf %5, %6 : vector<1024x64xf32>
    %8 = arith.truncf %7 : vector<1024x64xf32> to vector<1024x64xbf16>
    %c0_6 = arith.constant 0 : index
    %c0_7 = arith.constant 0 : index
    %9 = vector.load %arg5[%c0_6, %c0_7] : memref<1024x64xbf16, #tpu.memory_space<vmem>>, vector<1024x64xbf16>
    tpu.vector_store %arg5[%c0_6, %c0_7], %8 {strides = array<i32>} : memref<1024x64xbf16, #tpu.memory_space<vmem>>, vector<1024x64xbf16>,
    return
  }
  func.func @transform_0(%arg0: i32, %arg1: i32) -> (i32, i32) {
    %c0_i32 = arith.constant 0 : i32
    %c0_i32_0 = arith.constant 0 : i32
    return %arg0, %c0_i32 : i32, i32
  }
  func.func @transform_1(%arg0: i32, %arg1: i32) -> (i32, i32) {
    %c0_i32 = arith.constant 0 : i32
    %c0_i32_0 = arith.constant 0 : i32
    return %c0_i32, %arg1 : i32, i32
  }
  func.func @transform_2(%arg0: i32, %arg1: i32) -> (i32, i32) {
    %c0_i32 = arith.constant 0 : i32
    %c0_i32_0 = arith.constant 0 : i32
    return %c0_i32, %arg1 : i32, i32
  }
  func.func @transform_3(%arg0: i32, %arg1: i32) -> (i32, i32) {
    %c0_i32 = arith.constant 0 : i32
    return %arg0, %arg1 : i32, i32
  }
}

</mosaic_0001>

<bundles_post_ra>
// kernel: tpu_custom_call.1
= control target key start
LH: loop header
LB: loop body
LE: loop exit
PB: predicated region body
PF: predicated region fallthrough
CT: control target
= control target key end

     0   :  { %s3416_s12 = smov 0   ;;  %s3418_s13 = smov 0   ;;  %s4124_s0 = inlined_call_operand.vmem [shape: bf16[2048,196], index: 0, kind: input, shape index: {}]   ;;  %s4125_s1 = inlined_call_operand.vmem [shape: bf16[196,64], index: 1, kind: input, shape index: {}]   ;;  %s4126_s2 = inlined_call_operand.vmem [shape: f32[1,64], index: 2, kind: input, shape index: {}]   ;;  %s4127_s3 = inlined_call_operand.vmem [shape: bf16[2048,64], index: 3, kind: output, shape index: {}]  }
   0x1   :  { %s3420_s14 = smov 0  }
   0x2 LB: > { %s25_s15 = sadd.s32 1, %s3389_s13  ;;  %p2659_p0 = scmp.ge.s32.totalorder %s3393_s14, 1  ;;  %s3393_s14 = sphi %s3420_s14, %s13_s14   ;;  %s3389_s13 = sphi %s3418_s13, %s4129_s13   ;;  %s3385_s12 = sphi %s3416_s12, %s4128_s12  }
   0x3   : > { %p27_p1 = scmp.ge.s32.totalorder %s25_s15, 2  ;;  %p170_p2 = scmp.lt.s32.totalorder %s3393_s14, 3 }
   0x5   : > { %s4131_s15 = smov (%p27_p1, %s25_s15), 0  ;;  %p171_p3 = pnand %p2659_p0, %p170_p2 }
   0x6   : > { %s2660_s20 = sshll.u32 (!%p171_p3), %s3385_s12, 7 }
   0x7   : > { %174 = sbr.rel (%p171_p3) target bundleno = 517 (0x205), region = 32  ;;  %p206_p4 = scmp.lt.s32.totalorder (!%p171_p3), %s2660_s20, 255 }
   0xc   : > { %v3181_v0 = vld [vmem:[%s4125_s1 + $0x38] sm:$0xff]   ;;  %v3395_v1 = vmov 0   ;;  %v3182_v2 = vld [vmem:[%s4125_s1 + $0x30] sm:$0xff]   ;;  %s4133_s20 = smov (!%p206_p4, %s2660_s20), 255  ;;  %v3183_v3 = vld [vmem:[%s4125_s1 + $0x28] sm:$0xff]   ;;  %vm1040_vm0 = vcmask 556032  }
   0xd   : > { %1237 = vmatprep.subr.bf16.mxu0 %v3395_v1  ;;  %3130 = vmatprep.subr.bf16.mxu1 %v3395_v1  ;;  %s3001_s23 = sshll.u32 %s4133_s20, 3  ;;  %v3184_v4 = vld [vmem:[%s4125_s1 + $0x20] sm:$0xff]   ;;  %v3185_v6 = vld [vmem:[%s4125_s1 + $0x18] sm:$0xff]   ;;  %v3186_v8 = vld [vmem:[%s4125_s1 + $0x10] sm:$0xff]   ;;  %vm1233_vm1 = vcmask 1041408   ;;  %s2664_s26 = sshll.u32 %s4133_s20, 2 }
   0xe   : > { %1238 = vmatpush1.bf16.msra.mxu0 %v3181_v0  ;;  %3143 = vmatpush1.bf16.msra.mxu1 %v3181_v0  ;;  %s3458_s28 = scalar_lea.vmem %s4124_s0, %s3001_s23  ;;  %v3187_v9 = vld [vmem:[%s4125_s1 + $0x8] sm:$0xff]   ;;  %v3188_v10 = vld [vmem:[%s4125_s1] sm:$0xff]   ;;  %v3190_v13 = vld [vmem:[%s4125_s1 + $0x58] sm:$0xff]   ;;  %s3678_s20 = scalar_lea.vmem %s4127_s3, %s2664_s26  ;;  %vm2422_vm2 = vcmask 519168  }
   0xf   : > { %1239 = vmatprep.subr.bf16.mxu0 %v3395_v1  ;;  %3131 = vmatprep.subr.bf16.mxu1 %v3395_v1  ;;  %v3196_v5 = vld [vmem:[%s3458_s28 + $0x4] ss:$8 sps:$4 sm:$0xff]   ;;  %v3189_v11 = vld [vmem:[%s4125_s1 + $0x60] ss:$0 sps:$4 sm:$0x33]   ;;  %v3191_v14 = vld [vmem:[%s4125_s1 + $0x50] sm:$0xff]  }
  0x10   : > { %v3199_v7 = vld [vmem:[%s3458_s28 + $0x204] ss:$8 sps:$4 sm:$0xff]   ;;  %2807 = vmatprep.mubr.msk.bf16.mxu0 %vm1040_vm0, %v3196_v5  ;;  %v1235_v12 = vsel %vm1233_vm1, %v3189_v11, 0  ;;  %v3194_v17 = vld [vmem:[%s3458_s28] ss:$8 sps:$4 sm:$0xff]  }
  0x11   : > { %2839 = vmatprep.mubr.msk.bf16.mxu1 %vm1040_vm0, %v3199_v7  ;;  %v3192_v15 = vld [vmem:[%s4125_s1 + $0x48] sm:$0xff]   ;;  %v3193_v16 = vld [vmem:[%s4125_s1 + $0x40] sm:$0xff]   ;;  %v3200_v19 = vld [vmem:[%s3458_s28 + $0x14] ss:$8 sps:$4 sm:$0xff]  }
  0x12   : > { %1240 = vmatpush1.bf16.msra.mxu0 %v3182_v2  ;;  %3144 = vmatpush1.bf16.msra.mxu1 %v3182_v2  ;;  %v3197_v18 = vld [vmem:[%s3458_s28 + $0x200] ss:$8 sps:$4 sm:$0xff]   ;;  %v3202_v20 = vld [vmem:[%s3458_s28 + $0x214] ss:$8 sps:$4 sm:$0xff]   ;;  %v3204_v21 = vld [vmem:[%s3458_s28 + $0x10] ss:$8 sps:$4 sm:$0xff]  }
  0x13   : > { %1241 = vmatprep.subr.bf16.mxu0 %v3395_v1  ;;  %3132 = vmatprep.subr.bf16.mxu1 %v3395_v1  ;;  %v3205_v22 = vld [vmem:[%s3458_s28 + $0x210] ss:$8 sps:$4 sm:$0xff]   ;;  %v3206_v23 = vld [vmem:[%s3458_s28 + $0x24] ss:$8 sps:$4 sm:$0xff]   ;;  %v3210_v25 = vld [vmem:[%s3458_s28 + $0x20] ss:$8 sps:$4 sm:$0xff]  }
  0x14   : > { %v3208_v24 = vld [vmem:[%s3458_s28 + $0x224] ss:$8 sps:$4 sm:$0xff]   ;;  %v3211_v26 = vld [vmem:[%s3458_s28 + $0x220] ss:$8 sps:$4 sm:$0xff]   ;;  %v3212_v27 = vld [vmem:[%s3458_s28 + $0x34] ss:$8 sps:$4 sm:$0xff]  }
  0x15   : > { %v3214_v28 = vld [vmem:[%s3458_s28 + $0x234] ss:$8 sps:$4 sm:$0xff]   ;;  %v3216_v29 = vld [vmem:[%s3458_s28 + $0x30] ss:$8 sps:$4 sm:$0xff]   ;;  %v3218_v31 = vld [vmem:[%s3458_s28 + $0x44] ss:$8 sps:$4 sm:$0xff]  }
  0x16   : > { %1242 = vmatpush1.bf16.msra.mxu0 %v3183_v3  ;;  %3145 = vmatpush1.bf16.msra.mxu1 %v3183_v3  ;;  %v3217_v30 = vld [vmem:[%s3458_s28 + $0x230] ss:$8 sps:$4 sm:$0xff]   ;;  %v3220_v32 = vld [vmem:[%s3458_s28 + $0x244] ss:$8 sps:$4 sm:$0xff]   ;;  %v3222_v33 = vld [vmem:[%s3458_s28 + $0x40] ss:$8 sps:$4 sm:$0xff]  }
  0x17   : > { %1243 = vmatprep.subr.bf16.mxu0 %v3395_v1  ;;  %3133 = vmatprep.subr.bf16.mxu1 %v3395_v1  ;;  %v3223_v34 = vld [vmem:[%s3458_s28 + $0x240] ss:$8 sps:$4 sm:$0xff]   ;;  %v3224_v35 = vld [vmem:[%s3458_s28 + $0x54] ss:$8 sps:$4 sm:$0xff]   ;;  %v3228_v37 = vld [vmem:[%s3458_s28 + $0x50] ss:$8 sps:$4 sm:$0xff]  }
  0x18   : > { %v3226_v36 = vld [vmem:[%s3458_s28 + $0x254] ss:$8 sps:$4 sm:$0xff]   ;;  %v3229_v38 = vld [vmem:[%s3458_s28 + $0x250] ss:$8 sps:$4 sm:$0xff]   ;;  %v3230_v39 = vld [vmem:[%s3458_s28 + $0x64] ss:$8 sps:$4 sm:$0xff]  }
  0x19   : > { %v3232_v40 = vld [vmem:[%s3458_s28 + $0x264] ss:$8 sps:$4 sm:$0xff]   ;;  %v3234_v41 = vld [vmem:[%s3458_s28 + $0x60] ss:$8 sps:$4 sm:$0xff]   ;;  %v3236_v43 = vld [vmem:[%s3458_s28 + $0x74] ss:$8 sps:$4 sm:$0xff]  }
  0x1a   : > { %1244 = vmatpush1.bf16.msra.mxu0 %v3184_v4  ;;  %3146 = vmatpush1.bf16.msra.mxu1 %v3184_v4  ;;  %v3235_v42 = vld [vmem:[%s3458_s28 + $0x260] ss:$8 sps:$4 sm:$0xff]   ;;  %v3238_v44 = vld [vmem:[%s3458_s28 + $0x274] ss:$8 sps:$4 sm:$0xff]   ;;  %v3240_v45 = vld [vmem:[%s3458_s28 + $0x70] ss:$8 sps:$4 sm:$0xff]  }
  0x1b   : > { %1245 = vmatprep.subr.bf16.mxu0 %v3395_v1  ;;  %3134 = vmatprep.subr.bf16.mxu1 %v3395_v1  ;;  %v3241_v46 = vld [vmem:[%s3458_s28 + $0x270] ss:$8 sps:$4 sm:$0xff]   ;;  %v3242_v47 = vld [vmem:[%s3458_s28 + $0x84] ss:$8 sps:$4 sm:$0xff]   ;;  %v3246_v49 = vld [vmem:[%s3458_s28 + $0x80] ss:$8 sps:$4 sm:$0xff]  }
  0x1c   : > { %v3244_v48 = vld [vmem:[%s3458_s28 + $0x284] ss:$8 sps:$4 sm:$0xff]   ;;  %v3247_v50 = vld [vmem:[%s3458_s28 + $0x280] ss:$8 sps:$4 sm:$0xff]   ;;  %v3248_v51 = vld [vmem:[%s3458_s28 + $0x94] ss:$8 sps:$4 sm:$0xff]  }
  0x1d   : > { %v3250_v52 = vld [vmem:[%s3458_s28 + $0x294] ss:$8 sps:$4 sm:$0xff]   ;;  %v3252_v53 = vld [vmem:[%s3458_s28 + $0x90] ss:$8 sps:$4 sm:$0xff]   ;;  %v3254_v55 = vld [vmem:[%s3458_s28 + $0xa4] ss:$8 sps:$4 sm:$0xff]  }
  0x1e   : > { %1246 = vmatpush1.bf16.msra.mxu0 %v3185_v6  ;;  %3147 = vmatpush1.bf16.msra.mxu1 %v3185_v6  ;;  %v3253_v54 = vld [vmem:[%s3458_s28 + $0x290] ss:$8 sps:$4 sm:$0xff]   ;;  %v3256_v56 = vld [vmem:[%s3458_s28 + $0x2a4] ss:$8 sps:$4 sm:$0xff]   ;;  %v3258_v57 = vld [vmem:[%s3458_s28 + $0xa0] ss:$8 sps:$4 sm:$0xff]  }
  0x1f   : > { %1247 = vmatprep.subr.bf16.mxu0 %v3395_v1  ;;  %3135 = vmatprep.subr.bf16.mxu1 %v3395_v1  ;;  %v3259_v58 = vld [vmem:[%s3458_s28 + $0x2a0] ss:$8 sps:$4 sm:$0xff]   ;;  %v3260_v59 = vld [vmem:[%s3458_s28 + $0xb4] ss:$8 sps:$4 sm:$0xff]   ;;  %v3264_v61 = vld [vmem:[%s3458_s28 + $0xb0] ss:$8 sps:$4 sm:$0xff]  }
  0x20   : > { %v3262_v60 = vld [vmem:[%s3458_s28 + $0x2b4] ss:$8 sps:$4 sm:$0xff]   ;;  %v3265_v62 = vld [vmem:[%s3458_s28 + $0x2b0] ss:$8 sps:$4 sm:$0xff]   ;;  %v3266_v63 = vld [vmem:[%s3458_s28 + $0xc4] ss:$8 sps:$4 sm:$0xff]  }
  0x21   : > { %v3268_v0 = vld [vmem:[%s3458_s28 + $0x2c4] ss:$8 sps:$4 sm:$0xff]   ;;  %v3271_v2 = vld [vmem:[%s3458_s28 + $0x2c0] ss:$8 sps:$4 sm:$0xff]   ;;  %v3272_v3 = vld [vmem:[%s3458_s28 + $0xd4] ss:$8 sps:$4 sm:$0xff]  }
  0x22   : > { %1248 = vmatpush1.bf16.msra.mxu0 %v3186_v8  ;;  %3148 = vmatpush1.bf16.msra.mxu1 %v3186_v8  ;;  %v3274_v4 = vld [vmem:[%s3458_s28 + $0x2d4] ss:$8 sps:$4 sm:$0xff]   ;;  %v3276_v5 = vld [vmem:[%s3458_s28 + $0xd0] ss:$8 sps:$4 sm:$0xff]   ;;  %v3278_v7 = vld [vmem:[%s3458_s28 + $0xe4] ss:$8 sps:$4 sm:$0xff]  }
  0x23   : > { %1249 = vmatprep.subr.bf16.mxu0 %v3395_v1  ;;  %3136 = vmatprep.subr.bf16.mxu1 %v3395_v1  ;;  %v3277_v6 = vld [vmem:[%s3458_s28 + $0x2d0] ss:$8 sps:$4 sm:$0xff]   ;;  %v3280_v8 = vld [vmem:[%s3458_s28 + $0x2e4] ss:$8 sps:$4 sm:$0xff]   ;;  %v3284_v11 = vld [vmem:[%s3458_s28 + $0xf4] ss:$8 sps:$4 sm:$0xff]  }
  0x26   : > { %1250 = vmatpush1.bf16.msra.mxu0 %v3187_v9  ;;  %3149 = vmatpush1.bf16.msra.mxu1 %v3187_v9  ;;  %v3282_v9 = vld [vmem:[%s3458_s28 + $0xe0] ss:$8 sps:$4 sm:$0xff]  }
  0x27   : > { %1251 = vmatprep.subr.bf16.mxu0 %v3395_v1  ;;  %3137 = vmatprep.subr.bf16.mxu1 %v3395_v1 }
  0x2a   : > { %1252 = vmatpush1.bf16.msra.mxu0 %v3188_v10  ;;  %3150 = vmatpush1.bf16.msra.mxu1 %v3188_v10  ;;  %v3283_v10 = vld [vmem:[%s3458_s28 + $0x2e0] ss:$8 sps:$4 sm:$0xff]  }
  0x2b   : > { %1259 = vmatprep.subr.bf16.mxu0 %v3395_v1  ;;  %3138 = vmatprep.subr.bf16.mxu1 %v3395_v1 }
  0x2e   : > { %1260 = vmatpush2.bf16.msra.mxu0 %v1235_v12  ;;  %3151 = vmatpush2.bf16.msra.mxu1 %v1235_v12  ;;  %v3286_v12 = vld [vmem:[%s3458_s28 + $0x2f4] ss:$8 sps:$4 sm:$0xff]  }
  0x2f   : > { %1261 = vmatprep.subr.bf16.mxu0 %v3395_v1  ;;  %3139 = vmatprep.subr.bf16.mxu1 %v3395_v1 }
  0x32   : > { %1262 = vmatpush2.bf16.msra.mxu0 %v3190_v13  ;;  %3152 = vmatpush2.bf16.msra.mxu1 %v3190_v13  ;;  %v3288_v13 = vld [vmem:[%s3458_s28 + $0xf0] ss:$8 sps:$4 sm:$0xff]  }
  0x33   : > { %1263 = vmatprep.subr.bf16.mxu0 %v3395_v1  ;;  %3140 = vmatprep.subr.bf16.mxu1 %v3395_v1 }
  0x36   : > { %1264 = vmatpush2.bf16.msra.mxu0 %v3191_v14  ;;  %3153 = vmatpush2.bf16.msra.mxu1 %v3191_v14  ;;  %v3289_v14 = vld [vmem:[%s3458_s28 + $0x2f0] ss:$8 sps:$4 sm:$0xff]  }
  0x37   : > { %1265 = vmatprep.subr.bf16.mxu0 %v3395_v1  ;;  %3141 = vmatprep.subr.bf16.mxu1 %v3395_v1 }
  0x3a   : > { %1266 = vmatpush2.bf16.msra.mxu0 %v3192_v15  ;;  %3154 = vmatpush2.bf16.msra.mxu1 %v3192_v15  ;;  %v3290_v15 = vld [vmem:[%s3458_s28 + $0x104] ss:$8 sps:$4 sm:$0xff]  }
  0x3b   : > { %1267 = vmatprep.subr.bf16.mxu0 %v3395_v1  ;;  %3142 = vmatprep.subr.bf16.mxu1 %v3395_v1  ;;  %v3270_v1 = vld [vmem:[%s3458_s28 + $0xc0] ss:$8 sps:$4 sm:$0xff]  }
  0x3e   : > { %1268 = vmatpush2.bf16.msra.mxu0 %v3193_v16  ;;  %3155 = vmatpush2.bf16.msra.mxu1 %v3193_v16  ;;  %v3292_v16 = vld [vmem:[%s3458_s28 + $0x304] ss:$8 sps:$4 sm:$0xff]  }
  0x41   : > { %1270 = vmatmul.mubr.bf16.vlgmr.msra.gmra.mxu0 %v3194_v17  ;;  %1526 = vmatmul.mubr.bf16.vlgmr.msra.gmra.mxu1 %v3197_v18  ;;  %v3294_v17 = vld [vmem:[%s3458_s28 + $0x100] ss:$8 sps:$4 sm:$0xff]  }
  0x42   : > { %2808 = vmatprep.mubr.msk.bf16.mxu0 %vm1040_vm0, %v3200_v19  ;;  %2840 = vmatprep.mubr.msk.bf16.mxu1 %vm1040_vm0, %v3202_v20  ;;  %v3295_v18 = vld [vmem:[%s3458_s28 + $0x300] ss:$8 sps:$4 sm:$0xff]   ;;  %v3296_v19 = vld [vmem:[%s3458_s28 + $0x114] ss:$8 sps:$4 sm:$0xff]  }
  0x43   : > { %v3298_v20 = vld [vmem:[%s3458_s28 + $0x314] ss:$8 sps:$4 sm:$0xff]  }
  0x49   : > { %1278 = vmatmul.mubr.bf16.gmra.mxu0 %v3204_v21  ;;  %1534 = vmatmul.mubr.bf16.gmra.mxu1 %v3205_v22  ;;  %v3300_v21 = vld [vmem:[%s3458_s28 + $0x110] ss:$8 sps:$4 sm:$0xff]  }
  0x4a   : > { %2809 = vmatprep.mubr.msk.bf16.mxu0 %vm1040_vm0, %v3206_v23  ;;  %2841 = vmatprep.mubr.msk.bf16.mxu1 %vm1040_vm0, %v3208_v24  ;;  %v3301_v22 = vld [vmem:[%s3458_s28 + $0x310] ss:$8 sps:$4 sm:$0xff]   ;;  %v3302_v23 = vld [vmem:[%s3458_s28 + $0x124] ss:$8 sps:$4 sm:$0xff]  }
  0x4b   : > { %v3304_v24 = vld [vmem:[%s3458_s28 + $0x324] ss:$8 sps:$4 sm:$0xff]  }
  0x51   : > { %1286 = vmatmul.mubr.bf16.gmra.mxu0 %v3210_v25  ;;  %1542 = vmatmul.mubr.bf16.gmra.mxu1 %v3211_v26  ;;  %v3306_v25 = vld [vmem:[%s3458_s28 + $0x120] ss:$8 sps:$4 sm:$0xff]  }
  0x52   : > { %2810 = vmatprep.mubr.msk.bf16.mxu0 %vm1040_vm0, %v3212_v27  ;;  %2842 = vmatprep.mubr.msk.bf16.mxu1 %vm1040_vm0, %v3214_v28  ;;  %v3307_v26 = vld [vmem:[%s3458_s28 + $0x320] ss:$8 sps:$4 sm:$0xff]   ;;  %v3308_v27 = vld [vmem:[%s3458_s28 + $0x134] ss:$8 sps:$4 sm:$0xff]  }
  0x53   : > { %v3310_v28 = vld [vmem:[%s3458_s28 + $0x334] ss:$8 sps:$4 sm:$0xff]  }
  0x59   : > { %1294 = vmatmul.mubr.bf16.gmra.mxu0 %v3216_v29  ;;  %1550 = vmatmul.mubr.bf16.gmra.mxu1 %v3217_v30  ;;  %v3312_v29 = vld [vmem:[%s3458_s28 + $0x130] ss:$8 sps:$4 sm:$0xff]  }
  0x5a   : > { %2811 = vmatprep.mubr.msk.bf16.mxu0 %vm1040_vm0, %v3218_v31  ;;  %2843 = vmatprep.mubr.msk.bf16.mxu1 %vm1040_vm0, %v3220_v32  ;;  %v3313_v30 = vld [vmem:[%s3458_s28 + $0x330] ss:$8 sps:$4 sm:$0xff]   ;;  %v3314_v31 = vld [vmem:[%s3458_s28 + $0x144] ss:$8 sps:$4 sm:$0xff]  }
  0x5b   : > { %v3316_v32 = vld [vmem:[%s3458_s28 + $0x344] ss:$8 sps:$4 sm:$0xff]  }
  0x61   : > { %1302 = vmatmul.mubr.bf16.gmra.mxu0 %v3222_v33  ;;  %1558 = vmatmul.mubr.bf16.gmra.mxu1 %v3223_v34  ;;  %v3318_v33 = vld [vmem:[%s3458_s28 + $0x140] ss:$8 sps:$4 sm:$0xff]  }
  0x62   : > { %2812 = vmatprep.mubr.msk.bf16.mxu0 %vm1040_vm0, %v3224_v35  ;;  %2844 = vmatprep.mubr.msk.bf16.mxu1 %vm1040_vm0, %v3226_v36  ;;  %v3319_v34 = vld [vmem:[%s3458_s28 + $0x340] ss:$8 sps:$4 sm:$0xff]   ;;  %v3320_v35 = vld [vmem:[%s3458_s28 + $0x154] ss:$8 sps:$4 sm:$0xff]  }
  0x63   : > { %v3322_v36 = vld [vmem:[%s3458_s28 + $0x354] ss:$8 sps:$4 sm:$0xff]  }
  0x69   : > { %1310 = vmatmul.mubr.bf16.gmra.mxu0 %v3228_v37  ;;  %1566 = vmatmul.mubr.bf16.gmra.mxu1 %v3229_v38  ;;  %v3324_v37 = vld [vmem:[%s3458_s28 + $0x150] ss:$8 sps:$4 sm:$0xff]  }
  0x6a   : > { %2813 = vmatprep.mubr.msk.bf16.mxu0 %vm1040_vm0, %v3230_v39  ;;  %2845 = vmatprep.mubr.msk.bf16.mxu1 %vm1040_vm0, %v3232_v40  ;;  %v3325_v38 = vld [vmem:[%s3458_s28 + $0x350] ss:$8 sps:$4 sm:$0xff]   ;;  %v3326_v39 = vld [vmem:[%s3458_s28 + $0x164] ss:$8 sps:$4 sm:$0xff]  }
  0x6b   : > { %v3328_v40 = vld [vmem:[%s3458_s28 + $0x364] ss:$8 sps:$4 sm:$0xff]  }
  0x71   : > { %1318 = vmatmul.mubr.bf16.gmra.mxu0 %v3234_v41  ;;  %1574 = vmatmul.mubr.bf16.gmra.mxu1 %v3235_v42  ;;  %v3330_v41 = vld [vmem:[%s3458_s28 + $0x160] ss:$8 sps:$4 sm:$0xff]  }
  0x72   : > { %2814 = vmatprep.mubr.msk.bf16.mxu0 %vm1040_vm0, %v3236_v43  ;;  %2846 = vmatprep.mubr.msk.bf16.mxu1 %vm1040_vm0, %v3238_v44  ;;  %v3331_v42 = vld [vmem:[%s3458_s28 + $0x360] ss:$8 sps:$4 sm:$0xff]   ;;  %v3332_v43 = vld [vmem:[%s3458_s28 + $0x174] ss:$8 sps:$4 sm:$0xff]  }
  0x73   : > { %v3334_v44 = vld [vmem:[%s3458_s28 + $0x374] ss:$8 sps:$4 sm:$0xff]  }
  0x79   : > { %1326 = vmatmul.mubr.bf16.gmra.mxu0 %v3240_v45  ;;  %1582 = vmatmul.mubr.bf16.gmra.mxu1 %v3241_v46  ;;  %v3336_v45 = vld [vmem:[%s3458_s28 + $0x170] ss:$8 sps:$4 sm:$0xff]  }
  0x7a   : > { %2815 = vmatprep.mubr.msk.bf16.mxu0 %vm1040_vm0, %v3242_v47  ;;  %2847 = vmatprep.mubr.msk.bf16.mxu1 %vm1040_vm0, %v3244_v48  ;;  %v3337_v46 = vld [vmem:[%s3458_s28 + $0x370] ss:$8 sps:$4 sm:$0xff]   ;;  %v3338_v47 = vld [vmem:[%s3458_s28 + $0x184] ss:$8 sps:$4 sm:$0xff]  }
  0x7b   : > { %v3340_v48 = vld [vmem:[%s3458_s28 + $0x384] ss:$8 sps:$4 sm:$0xff]  }
  0x81   : > { %1334 = vmatmul.mubr.bf16.gmra.mxu0 %v3246_v49  ;;  %1590 = vmatmul.mubr.bf16.gmra.mxu1 %v3247_v50  ;;  %v277_v49 = vld [vmem:[%s3458_s28 + $0x180] sm:$0xff]  ;;  %v278_v50 = vld [vmem:[%s3458_s28 + $0x188] sm:$0xff] }
  0x82   : > { %2816 = vmatprep.mubr.msk.bf16.mxu0 %vm1040_vm0, %v3248_v51  ;;  %2848 = vmatprep.mubr.msk.bf16.mxu1 %vm1040_vm0, %v3250_v52  ;;  %v341_v51 = vld [vmem:[%s3458_s28 + $0x380] sm:$0xff]  ;;  %v342_v52 = vld [vmem:[%s3458_s28 + $0x388] sm:$0xff] }
  0x89   : > { %1342 = vmatmul.mubr.bf16.gmra.mxu0 %v3252_v53  ;;  %1598 = vmatmul.mubr.bf16.gmra.mxu1 %v3253_v54  ;;  %v2714_v53 = vcombine.low %v277_v49, %v278_v50  ;;  %v2778_v54 = vcombine.low %v341_v51, %v342_v52  ;;  %v283_v50 = vld [vmem:[%s3458_s28 + $0x1b0] sm:$0xff] }
  0x8a   : > { %2817 = vmatprep.mubr.msk.bf16.mxu0 %vm1040_vm0, %v3254_v55  ;;  %2849 = vmatprep.mubr.msk.bf16.mxu1 %vm1040_vm0, %v3256_v56  ;;  %v3342_v55 = vld [vmem:[%s3458_s28 + $0x194] ss:$8 sps:$4 sm:$0xff]  }
  0x8b   : > { %v3344_v56 = vld [vmem:[%s3458_s28 + $0x394] ss:$8 sps:$4 sm:$0xff]  }
  0x91   : > { %1350 = vmatmul.mubr.bf16.gmra.mxu0 %v3258_v57  ;;  %1606 = vmatmul.mubr.bf16.gmra.mxu1 %v3259_v58  ;;  %v3664_v57 = vld [vmem:[%s4126_s2] ss:$0 sm:$0xff] }
  0x92   : > { %2818 = vmatprep.mubr.msk.bf16.mxu0 %vm1040_vm0, %v3260_v59  ;;  %2850 = vmatprep.mubr.msk.bf16.mxu1 %vm1040_vm0, %v3262_v60  ;;  %v279_v60 = vld [vmem:[%s3458_s28 + $0x190] sm:$0xff] }
  0x99   : > { %1358 = vmatmul.mubr.bf16.gmra.mxu0 %v3264_v61  ;;  %1614 = vmatmul.mubr.bf16.gmra.mxu1 %v3265_v62 }
  0x9a   : > { %2819 = vmatprep.mubr.msk.bf16.mxu0 %vm1040_vm0, %v3266_v63  ;;  %2851 = vmatprep.mubr.msk.bf16.mxu1 %vm1040_vm0, %v3268_v0  ;;  %v280_v63 = vld [vmem:[%s3458_s28 + $0x198] sm:$0xff]  ;;  %v343_v0 = vld [vmem:[%s3458_s28 + $0x390] sm:$0xff] }
  0xa1   : > { %1366 = vmatmul.mubr.bf16.gmra.mxu0 %v3270_v1  ;;  %1622 = vmatmul.mubr.bf16.gmra.mxu1 %v3271_v2  ;;  %v344_v1 = vld [vmem:[%s3458_s28 + $0x398] sm:$0xff] }
  0xa2   : > { %2820 = vmatprep.mubr.msk.bf16.mxu0 %vm1040_vm0, %v3272_v3  ;;  %2852 = vmatprep.mubr.msk.bf16.mxu1 %vm1040_vm0, %v3274_v4 }
  0xa9   : > { %1374 = vmatmul.mubr.bf16.gmra.mxu0 %v3276_v5  ;;  %1630 = vmatmul.mubr.bf16.gmra.mxu1 %v3277_v6 }
  0xaa   : > { %2821 = vmatprep.mubr.msk.bf16.mxu0 %vm1040_vm0, %v3278_v7  ;;  %2853 = vmatprep.mubr.msk.bf16.mxu1 %vm1040_vm0, %v3280_v8  ;;  %v2716_v8 = vcombine.low %v279_v60, %v280_v63 }
  0xb1   : > { %1382 = vmatmul.mubr.bf16.gmra.mxu0 %v3282_v9  ;;  %1638 = vmatmul.mubr.bf16.gmra.mxu1 %v3283_v10  ;;  %v2780_v9 = vcombine.low %v343_v0, %v344_v1 }
  0xb2   : > { %2822 = vmatprep.mubr.msk.bf16.mxu0 %vm1040_vm0, %v3284_v11  ;;  %2854 = vmatprep.mubr.msk.bf16.mxu1 %vm1040_vm0, %v3286_v12 }
  0xb9   : > { %1390 = vmatmul.mubr.bf16.gmra.mxu0 %v3288_v13  ;;  %1646 = vmatmul.mubr.bf16.gmra.mxu1 %v3289_v14  ;;  %v3346_v14 = vld [vmem:[%s3458_s28 + $0x1a4] ss:$8 sps:$4 sm:$0xff]  }
  0xba   : > { %2823 = vmatprep.mubr.msk.bf16.mxu0 %vm1040_vm0, %v3290_v15  ;;  %2855 = vmatprep.mubr.msk.bf16.mxu1 %vm1040_vm0, %v3292_v16 }
  0xc1   : > { %1398 = vmatmul.mubr.bf16.gmra.mxu0 %v3294_v17  ;;  %1654 = vmatmul.mubr.bf16.gmra.mxu1 %v3295_v18  ;;  %v3348_v17 = vld [vmem:[%s3458_s28 + $0x3a4] ss:$8 sps:$4 sm:$0xff]  }
  0xc2   : > { %2824 = vmatprep.mubr.msk.bf16.mxu0 %vm1040_vm0, %v3296_v19  ;;  %2856 = vmatprep.mubr.msk.bf16.mxu1 %vm1040_vm0, %v3298_v20 }
  0xc9   : > { %1406 = vmatmul.mubr.bf16.gmra.mxu0 %v3300_v21  ;;  %1662 = vmatmul.mubr.bf16.gmra.mxu1 %v3301_v22  ;;  %v281_v22 = vld [vmem:[%s3458_s28 + $0x1a0] sm:$0xff] }
  0xca   : > { %2825 = vmatprep.mubr.msk.bf16.mxu0 %vm1040_vm0, %v3302_v23  ;;  %2857 = vmatprep.mubr.msk.bf16.mxu1 %vm1040_vm0, %v3304_v24 }
  0xd1   : > { %1414 = vmatmul.mubr.bf16.gmra.mxu0 %v3306_v25  ;;  %1670 = vmatmul.mubr.bf16.gmra.mxu1 %v3307_v26 }
  0xd2   : > { %2826 = vmatprep.mubr.msk.bf16.mxu0 %vm1040_vm0, %v3308_v27  ;;  %2858 = vmatprep.mubr.msk.bf16.mxu1 %vm1040_vm0, %v3310_v28  ;;  %v282_v27 = vld [vmem:[%s3458_s28 + $0x1a8] sm:$0xff]  ;;  %v345_v28 = vld [vmem:[%s3458_s28 + $0x3a0] sm:$0xff] }
  0xd9   : > { %1422 = vmatmul.mubr.bf16.gmra.mxu0 %v3312_v29  ;;  %1678 = vmatmul.mubr.bf16.gmra.mxu1 %v3313_v30  ;;  %v346_v29 = vld [vmem:[%s3458_s28 + $0x3a8] sm:$0xff] }
  0xda   : > { %2827 = vmatprep.mubr.msk.bf16.mxu0 %vm1040_vm0, %v3314_v31  ;;  %2859 = vmatprep.mubr.msk.bf16.mxu1 %vm1040_vm0, %v3316_v32 }
  0xe1   : > { %1430 = vmatmul.mubr.bf16.gmra.mxu0 %v3318_v33  ;;  %1686 = vmatmul.mubr.bf16.gmra.mxu1 %v3319_v34 }
  0xe2   : > { %2828 = vmatprep.mubr.msk.bf16.mxu0 %vm1040_vm0, %v3320_v35  ;;  %2860 = vmatprep.mubr.msk.bf16.mxu1 %vm1040_vm0, %v3322_v36  ;;  %v2718_v36 = vcombine.low %v281_v22, %v282_v27  ;;  %v350_v22 = vld [vmem:[%s3458_s28 + $0x3c8] sm:$0xff] }
  0xe9   : > { %1438 = vmatmul.mubr.bf16.gmra.mxu0 %v3324_v37  ;;  %1694 = vmatmul.mubr.bf16.gmra.mxu1 %v3325_v38  ;;  %v2782_v37 = vcombine.low %v345_v28, %v346_v29 }
  0xea   : > { %2829 = vmatprep.mubr.msk.bf16.mxu0 %vm1040_vm0, %v3326_v39  ;;  %2861 = vmatprep.mubr.msk.bf16.mxu1 %vm1040_vm0, %v3328_v40 }
  0xf1   : > { %1446 = vmatmul.mubr.bf16.gmra.mxu0 %v3330_v41  ;;  %1702 = vmatmul.mubr.bf16.gmra.mxu1 %v3331_v42  ;;  %v3350_v42 = vld [vmem:[%s3458_s28 + $0x1b4] ss:$8 sps:$4 sm:$0xff]  }
  0xf2   : > { %2830 = vmatprep.mubr.msk.bf16.mxu0 %vm1040_vm0, %v3332_v43  ;;  %2862 = vmatprep.mubr.msk.bf16.mxu1 %vm1040_vm0, %v3334_v44 }
  0xf9   : > { %1454 = vmatmul.mubr.bf16.gmra.mxu0 %v3336_v45  ;;  %1710 = vmatmul.mubr.bf16.gmra.mxu1 %v3337_v46  ;;  %v3352_v45 = vld [vmem:[%s3458_s28 + $0x3b4] ss:$8 sps:$4 sm:$0xff]  }
  0xfa   : > { %2831 = vmatprep.mubr.msk.bf16.mxu0 %vm1040_vm0, %v3338_v47  ;;  %2863 = vmatprep.mubr.msk.bf16.mxu1 %vm1040_vm0, %v3340_v48 }
 0x101   : > { %v1271_v58 = vpop.f32.mrf.mxu0  ;;  %1462 = vmatmul.mubr.bf16.gmra.mxu0 %v2714_v53  ;;  %v1527_v59 = vpop.f32.mrf.mxu1  ;;  %1718 = vmatmul.mubr.bf16.gmra.mxu1 %v2778_v54 }
 0x102   : > { %v1272_v61 = vadd.f32 %v3664_v57, %v1271_v58  ;;  %v1528_v62 = vadd.f32 %v3664_v57, %v1527_v59  ;;  %2832 = vmatprep.mubr.msk.bf16.mxu0 %vm1040_vm0, %v3342_v55  ;;  %2864 = vmatprep.mubr.msk.bf16.mxu1 %vm1040_vm0, %v3344_v56  ;;  %v284_v55 = vld [vmem:[%s3458_s28 + $0x1b8] sm:$0xff]  ;;  %v347_v56 = vld [vmem:[%s3458_s28 + $0x3b0] sm:$0xff] }
 0x103   : > { %v1273_v2 = vpop.f32.mrf.mxu0  ;;  %v1529_v3 = vpop.f32.mrf.mxu1  ;;  %v348_v58 = vld [vmem:[%s3458_s28 + $0x3b8] sm:$0xff]  ;;  %v2720_v1 = vcombine.low %v283_v50, %v284_v55 }
 0x104   : > { %v1782_v4 = vmax.f32 %v1272_v61, 0.0  ;;  %v1846_v5 = vmax.f32 %v1528_v62, 0.0  ;;  %v2784_v2 = vcombine.low %v347_v56, %v348_v58  ;;  %v352_v50 = vld [vmem:[%s3458_s28 + $0x3d8] sm:$0xff] }
 0x105   : > { %v1274_v6 = vpop.f32.mrf.mxu0  ;;  %v1530_v7 = vpop.f32.mrf.mxu1 }
 0x106   : > { %v3002_v10 = vpack.c.bf16 %v1782_v4, %v1782_v4  ;;  %v3066_v11 = vpack.c.bf16 %v1846_v5, %v1846_v5  ;;  %v1275_v12 = vadd.f32 %v3664_v57, %v1274_v6  ;;  %v1531_v13 = vadd.f32 %v3664_v57, %v1530_v7  ;;  %v3354_v7 = vld [vmem:[%s3458_s28 + $0x1c4] ss:$8 sps:$4 sm:$0xff]  }
 0x107   : > { %v1276_v15 = vpop.f32.mrf.mxu0  ;;  %v1532_v16 = vpop.f32.mrf.mxu1 }
 0x108   : > { %2423 = vst.msk [vmem:[%s3678_s20] sm:$0xf] %vm2422_vm2, %v3002_v10  ;;  %2487 = vst.msk [vmem:[%s3678_s20 + $0x100] sm:$0xf] %vm2422_vm2, %v3066_v11  ;;  %v1783_v18 = vmax.f32 %v1275_v12, 0.0  ;;  %v1847_v19 = vmax.f32 %v1531_v13, 0.0 }
 0x109   : > { %v1279_v20 = vpop.f32.mrf.mxu0  ;;  %1470 = vmatmul.mubr.bf16.gmra.mxu0 %v2716_v8  ;;  %v1535_v21 = vpop.f32.mrf.mxu1  ;;  %1726 = vmatmul.mubr.bf16.gmra.mxu1 %v2780_v9  ;;  %v3356_v10 = vld [vmem:[%s3458_s28 + $0x3c4] ss:$8 sps:$4 sm:$0xff]  }
 0x10a   : > { %v3003_v23 = vpack.c.bf16 %v1783_v18, %v1783_v18  ;;  %v3067_v24 = vpack.c.bf16 %v1847_v19, %v1847_v19  ;;  %v1280_v25 = vadd.f32 %v3664_v57, %v1279_v20  ;;  %v1536_v26 = vadd.f32 %v3664_v57, %v1535_v21  ;;  %2833 = vmatprep.mubr.msk.bf16.mxu0 %vm1040_vm0, %v3346_v14  ;;  %v285_v15 = vld [vmem:[%s3458_s28 + $0x1c0] sm:$0xff]  ;;  %v286_v20 = vld [vmem:[%s3458_s28 + $0x1c8] sm:$0xff] }
 0x10b   : > { %v1281_v30 = vpop.f32.mrf.mxu0  ;;  %v1537_v31 = vpop.f32.mrf.mxu1  ;;  %2865 = vmatprep.mubr.msk.bf16.mxu1 %vm1040_vm0, %v3348_v17  ;;  %v349_v21 = vld [vmem:[%s3458_s28 + $0x3c0] sm:$0xff]  ;;  %v2722_v29 = vcombine.low %v285_v15, %v286_v20  ;;  %v354_v15 = vld [vmem:[%s3458_s28 + $0x3e8] sm:$0xff] }
 0x10c   : > { %2424 = vst.msk [vmem:[%s3678_s20 + $0x4] sm:$0xf] %vm2422_vm2, %v3003_v23  ;;  %2488 = vst.msk [vmem:[%s3678_s20 + $0x104] sm:$0xf] %vm2422_vm2, %v3067_v24  ;;  %v1784_v32 = vmax.f32 %v1280_v25, 0.0  ;;  %v1848_v33 = vmax.f32 %v1536_v26, 0.0  ;;  %v2786_v30 = vcombine.low %v349_v21, %v350_v22 }
 0x10d   : > { %v1282_v34 = vpop.f32.mrf.mxu0  ;;  %v1538_v35 = vpop.f32.mrf.mxu1 }
 0x10e   : > { %v3004_v38 = vpack.c.bf16 %v1784_v32, %v1784_v32  ;;  %v3068_v39 = vpack.c.bf16 %v1848_v33, %v1848_v33  ;;  %v1283_v40 = vadd.f32 %v3664_v57, %v1282_v34  ;;  %v1539_v41 = vadd.f32 %v3664_v57, %v1538_v35  ;;  %v3358_v35 = vld [vmem:[%s3458_s28 + $0x1d4] ss:$8 sps:$4 sm:$0xff]  }
 0x10f   : > { %v1284_v43 = vpop.f32.mrf.mxu0  ;;  %v1540_v44 = vpop.f32.mrf.mxu1 }
 0x110   : > { %2425 = vst.msk [vmem:[%s3678_s20 + $0x8] sm:$0xf] %vm2422_vm2, %v3004_v38  ;;  %2489 = vst.msk [vmem:[%s3678_s20 + $0x108] sm:$0xf] %vm2422_vm2, %v3068_v39  ;;  %v1785_v46 = vmax.f32 %v1283_v40, 0.0  ;;  %v1849_v47 = vmax.f32 %v1539_v41, 0.0 }
 0x111   : > { %v1287_v48 = vpop.f32.mrf.mxu0  ;;  %1478 = vmatmul.mubr.bf16.gmra.mxu0 %v2718_v36  ;;  %v1543_v49 = vpop.f32.mrf.mxu1  ;;  %1734 = vmatmul.mubr.bf16.gmra.mxu1 %v2782_v37  ;;  %v3360_v38 = vld [vmem:[%s3458_s28 + $0x3d4] ss:$8 sps:$4 sm:$0xff]  }
 0x112   : > { %v3005_v51 = vpack.c.bf16 %v1785_v46, %v1785_v46  ;;  %v3069_v52 = vpack.c.bf16 %v1849_v47, %v1849_v47  ;;  %v1288_v53 = vadd.f32 %v3664_v57, %v1287_v48  ;;  %v1544_v54 = vadd.f32 %v3664_v57, %v1543_v49  ;;  %2834 = vmatprep.mubr.msk.bf16.mxu0 %vm1040_vm0, %v3350_v42  ;;  %v287_v43 = vld [vmem:[%s3458_s28 + $0x1d0] sm:$0xff]  ;;  %v288_v48 = vld [vmem:[%s3458_s28 + $0x1d8] sm:$0xff] }
 0x113   : > { %v1289_v59 = vpop.f32.mrf.mxu0  ;;  %v1545_v60 = vpop.f32.mrf.mxu1  ;;  %2866 = vmatprep.mubr.msk.bf16.mxu1 %vm1040_vm0, %v3352_v45  ;;  %v351_v49 = vld [vmem:[%s3458_s28 + $0x3d0] sm:$0xff]  ;;  %v2724_v58 = vcombine.low %v287_v43, %v288_v48  ;;  %v356_v43 = vld [vmem:[%s3458_s28 + $0x3f8] sm:$0xff] }
 0x114   : > { %2426 = vst.msk [vmem:[%s3678_s20 + $0xc] sm:$0xf] %vm2422_vm2, %v3005_v51  ;;  %2490 = vst.msk [vmem:[%s3678_s20 + $0x10c] sm:$0xf] %vm2422_vm2, %v3069_v52  ;;  %v1786_v61 = vmax.f32 %v1288_v53, 0.0  ;;  %v1850_v62 = vmax.f32 %v1544_v54, 0.0  ;;  %v2788_v59 = vcombine.low %v351_v49, %v352_v50 }
 0x115   : > { %v1290_v63 = vpop.f32.mrf.mxu0  ;;  %v1546_v0 = vpop.f32.mrf.mxu1 }
 0x116   : > { %v3006_v3 = vpack.c.bf16 %v1786_v61, %v1786_v61  ;;  %v3070_v4 = vpack.c.bf16 %v1850_v62, %v1850_v62  ;;  %v1291_v5 = vadd.f32 %v3664_v57, %v1290_v63  ;;  %v1547_v6 = vadd.f32 %v3664_v57, %v1546_v0  ;;  %v3362_v0 = vld [vmem:[%s3458_s28 + $0x1e4] ss:$8 sps:$4 sm:$0xff]  }
 0x117   : > { %v1292_v8 = vpop.f32.mrf.mxu0  ;;  %v1548_v9 = vpop.f32.mrf.mxu1 }
 0x118   : > { %2427 = vst.msk [vmem:[%s3678_s20 + $0x10] sm:$0xf] %vm2422_vm2, %v3006_v3  ;;  %2491 = vst.msk [vmem:[%s3678_s20 + $0x110] sm:$0xf] %vm2422_vm2, %v3070_v4  ;;  %v1787_v11 = vmax.f32 %v1291_v5, 0.0  ;;  %v1851_v12 = vmax.f32 %v1547_v6, 0.0 }
 0x119   : > { %v1295_v13 = vpop.f32.mrf.mxu0  ;;  %1486 = vmatmul.mubr.bf16.gmra.mxu0 %v2720_v1  ;;  %v1551_v14 = vpop.f32.mrf.mxu1  ;;  %1742 = vmatmul.mubr.bf16.gmra.mxu1 %v2784_v2  ;;  %v3364_v3 = vld [vmem:[%s3458_s28 + $0x3e4] ss:$8 sps:$4 sm:$0xff]  }
 0x11a   : > { %v3007_v16 = vpack.c.bf16 %v1787_v11, %v1787_v11  ;;  %v3071_v17 = vpack.c.bf16 %v1851_v12, %v1851_v12  ;;  %v1296_v18 = vadd.f32 %v3664_v57, %v1295_v13  ;;  %v1552_v19 = vadd.f32 %v3664_v57, %v1551_v14  ;;  %2835 = vmatprep.mubr.msk.bf16.mxu0 %vm1040_vm0, %v3354_v7  ;;  %v289_v8 = vld [vmem:[%s3458_s28 + $0x1e0] sm:$0xff]  ;;  %v290_v13 = vld [vmem:[%s3458_s28 + $0x1e8] sm:$0xff] }
 0x11b   : > { %v1297_v23 = vpop.f32.mrf.mxu0  ;;  %v1553_v24 = vpop.f32.mrf.mxu1  ;;  %2867 = vmatprep.mubr.msk.bf16.mxu1 %vm1040_vm0, %v3356_v10  ;;  %v353_v14 = vld [vmem:[%s3458_s28 + $0x3e0] sm:$0xff]  ;;  %v2726_v22 = vcombine.low %v289_v8, %v290_v13 }
 0x11c   : > { %2428 = vst.msk [vmem:[%s3678_s20 + $0x14] sm:$0xf] %vm2422_vm2, %v3007_v16  ;;  %2492 = vst.msk [vmem:[%s3678_s20 + $0x114] sm:$0xf] %vm2422_vm2, %v3071_v17  ;;  %v1788_v25 = vmax.f32 %v1296_v18, 0.0  ;;  %v1852_v26 = vmax.f32 %v1552_v19, 0.0  ;;  %v2790_v23 = vcombine.low %v353_v14, %v354_v15 }
 0x11d   : > { %v1298_v27 = vpop.f32.mrf.mxu0  ;;  %v1554_v28 = vpop.f32.mrf.mxu1 }
 0x11e   : > { %v3008_v31 = vpack.c.bf16 %v1788_v25, %v1788_v25  ;;  %v3072_v32 = vpack.c.bf16 %v1852_v26, %v1852_v26  ;;  %v1299_v33 = vadd.f32 %v3664_v57, %v1298_v27  ;;  %v1555_v34 = vadd.f32 %v3664_v57, %v1554_v28  ;;  %v3366_v28 = vld [vmem:[%s3458_s28 + $0x1f4] ss:$8 sps:$4 sm:$0xff]  }
 0x11f   : > { %v1300_v36 = vpop.f32.mrf.mxu0  ;;  %v1556_v37 = vpop.f32.mrf.mxu1 }
 0x120   : > { %2429 = vst.msk [vmem:[%s3678_s20 + $0x18] sm:$0xf] %vm2422_vm2, %v3008_v31  ;;  %2493 = vst.msk [vmem:[%s3678_s20 + $0x118] sm:$0xf] %vm2422_vm2, %v3072_v32  ;;  %v1789_v39 = vmax.f32 %v1299_v33, 0.0  ;;  %v1853_v40 = vmax.f32 %v1555_v34, 0.0 }
 0x121   : > { %v1303_v41 = vpop.f32.mrf.mxu0  ;;  %1494 = vmatmul.mubr.bf16.gmra.mxu0 %v2722_v29  ;;  %v1559_v42 = vpop.f32.mrf.mxu1  ;;  %1750 = vmatmul.mubr.bf16.gmra.mxu1 %v2786_v30  ;;  %v3368_v31 = vld [vmem:[%s3458_s28 + $0x3f4] ss:$8 sps:$4 sm:$0xff]  }
 0x122   : > { %v3009_v44 = vpack.c.bf16 %v1789_v39, %v1789_v39  ;;  %v3073_v45 = vpack.c.bf16 %v1853_v40, %v1853_v40  ;;  %v1304_v46 = vadd.f32 %v3664_v57, %v1303_v41  ;;  %v1560_v47 = vadd.f32 %v3664_v57, %v1559_v42  ;;  %2836 = vmatprep.mubr.msk.bf16.mxu0 %vm1040_vm0, %v3358_v35  ;;  %v291_v36 = vld [vmem:[%s3458_s28 + $0x1f0] sm:$0xff]  ;;  %v292_v41 = vld [vmem:[%s3458_s28 + $0x1f8] sm:$0xff] }
 0x123   : > { %v1305_v51 = vpop.f32.mrf.mxu0  ;;  %v1561_v52 = vpop.f32.mrf.mxu1  ;;  %2868 = vmatprep.mubr.msk.bf16.mxu1 %vm1040_vm0, %v3360_v38  ;;  %v355_v42 = vld [vmem:[%s3458_s28 + $0x3f0] sm:$0xff]  ;;  %v2728_v50 = vcombine.low %v291_v36, %v292_v41 }
 0x124   : > { %2430 = vst.msk [vmem:[%s3678_s20 + $0x1c] sm:$0xf] %vm2422_vm2, %v3009_v44  ;;  %2494 = vst.msk [vmem:[%s3678_s20 + $0x11c] sm:$0xf] %vm2422_vm2, %v3073_v45  ;;  %v1790_v53 = vmax.f32 %v1304_v46, 0.0  ;;  %v1854_v54 = vmax.f32 %v1560_v47, 0.0  ;;  %v2792_v51 = vcombine.low %v355_v42, %v356_v43 }
 0x125   : > { %v1306_v55 = vpop.f32.mrf.mxu0  ;;  %v1562_v56 = vpop.f32.mrf.mxu1 }
 0x126   : > { %v3010_v60 = vpack.c.bf16 %v1790_v53, %v1790_v53  ;;  %v3074_v61 = vpack.c.bf16 %v1854_v54, %v1854_v54  ;;  %v1307_v62 = vadd.f32 %v3664_v57, %v1306_v55  ;;  %v1563_v63 = vadd.f32 %v3664_v57, %v1562_v56 }
 0x127   : > { %v1308_v1 = vpop.f32.mrf.mxu0  ;;  %v1564_v2 = vpop.f32.mrf.mxu1 }
 0x128   : > { %2431 = vst.msk [vmem:[%s3678_s20 + $0x20] sm:$0xf] %vm2422_vm2, %v3010_v60  ;;  %2495 = vst.msk [vmem:[%s3678_s20 + $0x120] sm:$0xf] %vm2422_vm2, %v3074_v61  ;;  %v1791_v4 = vmax.f32 %v1307_v62, 0.0  ;;  %v1855_v5 = vmax.f32 %v1563_v63, 0.0 }
 0x129   : > { %v1311_v6 = vpop.f32.mrf.mxu0  ;;  %1502 = vmatmul.mubr.bf16.gmra.mxu0 %v2724_v58  ;;  %v1567_v7 = vpop.f32.mrf.mxu1  ;;  %1758 = vmatmul.mubr.bf16.gmra.mxu1 %v2788_v59 }
 0x12a   : > { %v3011_v9 = vpack.c.bf16 %v1791_v4, %v1791_v4  ;;  %v3075_v10 = vpack.c.bf16 %v1855_v5, %v1855_v5  ;;  %v1312_v11 = vadd.f32 %v3664_v57, %v1311_v6  ;;  %v1568_v12 = vadd.f32 %v3664_v57, %v1567_v7  ;;  %2837 = vmatprep.mubr.msk.bf16.mxu0 %vm1040_vm0, %v3362_v0 }
 0x12b   : > { %v1313_v16 = vpop.f32.mrf.mxu0  ;;  %v1569_v17 = vpop.f32.mrf.mxu1  ;;  %2869 = vmatprep.mubr.msk.bf16.mxu1 %vm1040_vm0, %v3364_v3 }
 0x12c   : > { %2432 = vst.msk [vmem:[%s3678_s20 + $0x24] sm:$0xf] %vm2422_vm2, %v3011_v9  ;;  %2496 = vst.msk [vmem:[%s3678_s20 + $0x124] sm:$0xf] %vm2422_vm2, %v3075_v10  ;;  %v1792_v18 = vmax.f32 %v1312_v11, 0.0  ;;  %v1856_v19 = vmax.f32 %v1568_v12, 0.0 }
 0x12d   : > { %v1314_v20 = vpop.f32.mrf.mxu0  ;;  %v1570_v21 = vpop.f32.mrf.mxu1 }
 0x12e   : > { %v3012_v24 = vpack.c.bf16 %v1792_v18, %v1792_v18  ;;  %v3076_v25 = vpack.c.bf16 %v1856_v19, %v1856_v19  ;;  %v1315_v26 = vadd.f32 %v3664_v57, %v1314_v20  ;;  %v1571_v27 = vadd.f32 %v3664_v57, %v1570_v21 }
 0x12f   : > { %v1316_v29 = vpop.f32.mrf.mxu0  ;;  %v1572_v30 = vpop.f32.mrf.mxu1 }
 0x130   : > { %2433 = vst.msk [vmem:[%s3678_s20 + $0x28] sm:$0xf] %vm2422_vm2, %v3012_v24  ;;  %2497 = vst.msk [vmem:[%s3678_s20 + $0x128] sm:$0xf] %vm2422_vm2, %v3076_v25  ;;  %v1793_v32 = vmax.f32 %v1315_v26, 0.0  ;;  %v1857_v33 = vmax.f32 %v1571_v27, 0.0 }
 0x131   : > { %v1319_v34 = vpop.f32.mrf.mxu0  ;;  %1510 = vmatmul.mubr.bf16.gmra.mxu0 %v2726_v22  ;;  %v1575_v35 = vpop.f32.mrf.mxu1  ;;  %1766 = vmatmul.mubr.bf16.gmra.mxu1 %v2790_v23 }
 0x132   : > { %v3013_v37 = vpack.c.bf16 %v1793_v32, %v1793_v32  ;;  %v3077_v38 = vpack.c.bf16 %v1857_v33, %v1857_v33  ;;  %v1320_v39 = vadd.f32 %v3664_v57, %v1319_v34  ;;  %v1576_v40 = vadd.f32 %v3664_v57, %v1575_v35  ;;  %2838 = vmatprep.mubr.msk.bf16.mxu0 %vm1040_vm0, %v3366_v28 }
 0x133   : > { %v1321_v44 = vpop.f32.mrf.mxu0  ;;  %v1577_v45 = vpop.f32.mrf.mxu1  ;;  %2870 = vmatprep.mubr.msk.bf16.mxu1 %vm1040_vm0, %v3368_v31 }
 0x134   : > { %2434 = vst.msk [vmem:[%s3678_s20 + $0x2c] sm:$0xf] %vm2422_vm2, %v3013_v37  ;;  %2498 = vst.msk [vmem:[%s3678_s20 + $0x12c] sm:$0xf] %vm2422_vm2, %v3077_v38  ;;  %v1794_v46 = vmax.f32 %v1320_v39, 0.0  ;;  %v1858_v47 = vmax.f32 %v1576_v40, 0.0 }
 0x135   : > { %v1322_v48 = vpop.f32.mrf.mxu0  ;;  %v1578_v49 = vpop.f32.mrf.mxu1 }
 0x136   : > { %v3014_v52 = vpack.c.bf16 %v1794_v46, %v1794_v46  ;;  %v3078_v53 = vpack.c.bf16 %v1858_v47, %v1858_v47  ;;  %v1323_v54 = vadd.f32 %v3664_v57, %v1322_v48  ;;  %v1579_v55 = vadd.f32 %v3664_v57, %v1578_v49 }
 0x137   : > { %v1324_v56 = vpop.f32.mrf.mxu0  ;;  %v1580_v58 = vpop.f32.mrf.mxu1 }
 0x138   : > { %2435 = vst.msk [vmem:[%s3678_s20 + $0x30] sm:$0xf] %vm2422_vm2, %v3014_v52  ;;  %2499 = vst.msk [vmem:[%s3678_s20 + $0x130] sm:$0xf] %vm2422_vm2, %v3078_v53  ;;  %v1795_v59 = vmax.f32 %v1323_v54, 0.0  ;;  %v1859_v60 = vmax.f32 %v1579_v55, 0.0 }
 0x139   : > { %v1327_v61 = vpop.f32.mrf.mxu0  ;;  %1518 = vmatmul.mubr.bf16.gmra.mxu0 %v2728_v50  ;;  %v1583_v62 = vpop.f32.mrf.mxu1  ;;  %1774 = vmatmul.mubr.bf16.gmra.mxu1 %v2792_v51 }
 0x13a   : > { %v3015_v63 = vpack.c.bf16 %v1795_v59, %v1795_v59  ;;  %v3079_v0 = vpack.c.bf16 %v1859_v60, %v1859_v60  ;;  %v1328_v1 = vadd.f32 %v3664_v57, %v1327_v61  ;;  %v1584_v2 = vadd.f32 %v3664_v57, %v1583_v62 }
 0x13b   : > { %v1329_v3 = vpop.f32.mrf.mxu0  ;;  %v1585_v4 = vpop.f32.mrf.mxu1 }
 0x13c   : > { %2436 = vst.msk [vmem:[%s3678_s20 + $0x34] sm:$0xf] %vm2422_vm2, %v3015_v63  ;;  %2500 = vst.msk [vmem:[%s3678_s20 + $0x134] sm:$0xf] %vm2422_vm2, %v3079_v0  ;;  %v1796_v5 = vmax.f32 %v1328_v1, 0.0  ;;  %v1860_v6 = vmax.f32 %v1584_v2, 0.0 }
 0x13d   : > { %v1330_v7 = vpop.f32.mrf.mxu0  ;;  %v1586_v8 = vpop.f32.mrf.mxu1 }
 0x13e   : > { %v3016_v9 = vpack.c.bf16 %v1796_v5, %v1796_v5  ;;  %v3080_v10 = vpack.c.bf16 %v1860_v6, %v1860_v6  ;;  %v1331_v11 = vadd.f32 %v3664_v57, %v1330_v7  ;;  %v1587_v12 = vadd.f32 %v3664_v57, %v1586_v8 }
 0x13f   : > { %v1332_v13 = vpop.f32.mrf.mxu0  ;;  %v1588_v14 = vpop.f32.mrf.mxu1 }
 0x140   : > { %2437 = vst.msk [vmem:[%s3678_s20 + $0x38] sm:$0xf] %vm2422_vm2, %v3016_v9  ;;  %2501 = vst.msk [vmem:[%s3678_s20 + $0x138] sm:$0xf] %vm2422_vm2, %v3080_v10  ;;  %v1797_v15 = vmax.f32 %v1331_v11, 0.0  ;;  %v1861_v16 = vmax.f32 %v1587_v12, 0.0 }
 0x141   : > { %v1335_v17 = vpop.f32.mrf.mxu0  ;;  %v1591_v18 = vpop.f32.mrf.mxu1 }
 0x142   : > { %v3017_v19 = vpack.c.bf16 %v1797_v15, %v1797_v15  ;;  %v3081_v20 = vpack.c.bf16 %v1861_v16, %v1861_v16  ;;  %v1336_v21 = vadd.f32 %v3664_v57, %v1335_v17  ;;  %v1592_v22 = vadd.f32 %v3664_v57, %v1591_v18 }
 0x143   : > { %v1337_v23 = vpop.f32.mrf.mxu0  ;;  %v1593_v24 = vpop.f32.mrf.mxu1 }
 0x144   : > { %2438 = vst.msk [vmem:[%s3678_s20 + $0x3c] sm:$0xf] %vm2422_vm2, %v3017_v19  ;;  %2502 = vst.msk [vmem:[%s3678_s20 + $0x13c] sm:$0xf] %vm2422_vm2, %v3081_v20  ;;  %v1798_v25 = vmax.f32 %v1336_v21, 0.0  ;;  %v1862_v26 = vmax.f32 %v1592_v22, 0.0 }
 0x145   : > { %v1338_v27 = vpop.f32.mrf.mxu0  ;;  %v1594_v28 = vpop.f32.mrf.mxu1 }
 0x146   : > { %v3018_v29 = vpack.c.bf16 %v1798_v25, %v1798_v25  ;;  %v3082_v30 = vpack.c.bf16 %v1862_v26, %v1862_v26  ;;  %v1339_v31 = vadd.f32 %v3664_v57, %v1338_v27  ;;  %v1595_v32 = vadd.f32 %v3664_v57, %v1594_v28 }
 0x147   : > { %v1340_v33 = vpop.f32.mrf.mxu0  ;;  %v1596_v34 = vpop.f32.mrf.mxu1 }
 0x148   : > { %2439 = vst.msk [vmem:[%s3678_s20 + $0x40] sm:$0xf] %vm2422_vm2, %v3018_v29  ;;  %2503 = vst.msk [vmem:[%s3678_s20 + $0x140] sm:$0xf] %vm2422_vm2, %v3082_v30  ;;  %v1799_v35 = vmax.f32 %v1339_v31, 0.0  ;;  %v1863_v36 = vmax.f32 %v1595_v32, 0.0 }
 0x149   : > { %v1343_v37 = vpop.f32.mrf.mxu0  ;;  %v1599_v38 = vpop.f32.mrf.mxu1 }
 0x14a   : > { %v3019_v39 = vpack.c.bf16 %v1799_v35, %v1799_v35  ;;  %v3083_v40 = vpack.c.bf16 %v1863_v36, %v1863_v36  ;;  %v1344_v41 = vadd.f32 %v3664_v57, %v1343_v37  ;;  %v1600_v42 = vadd.f32 %v3664_v57, %v1599_v38 }
 0x14b   : > { %v1345_v43 = vpop.f32.mrf.mxu0  ;;  %v1601_v44 = vpop.f32.mrf.mxu1 }
 0x14c   : > { %2440 = vst.msk [vmem:[%s3678_s20 + $0x44] sm:$0xf] %vm2422_vm2, %v3019_v39  ;;  %2504 = vst.msk [vmem:[%s3678_s20 + $0x144] sm:$0xf] %vm2422_vm2, %v3083_v40  ;;  %v1800_v45 = vmax.f32 %v1344_v41, 0.0  ;;  %v1864_v46 = vmax.f32 %v1600_v42, 0.0 }
 0x14d   : > { %v1346_v47 = vpop.f32.mrf.mxu0  ;;  %v1602_v48 = vpop.f32.mrf.mxu1 }
 0x14e   : > { %v3020_v49 = vpack.c.bf16 %v1800_v45, %v1800_v45  ;;  %v3084_v50 = vpack.c.bf16 %v1864_v46, %v1864_v46  ;;  %v1347_v51 = vadd.f32 %v3664_v57, %v1346_v47  ;;  %v1603_v52 = vadd.f32 %v3664_v57, %v1602_v48 }
 0x14f   : > { %v1348_v53 = vpop.f32.mrf.mxu0  ;;  %v1604_v54 = vpop.f32.mrf.mxu1 }
 0x150   : > { %2441 = vst.msk [vmem:[%s3678_s20 + $0x48] sm:$0xf] %vm2422_vm2, %v3020_v49  ;;  %2505 = vst.msk [vmem:[%s3678_s20 + $0x148] sm:$0xf] %vm2422_vm2, %v3084_v50  ;;  %v1801_v55 = vmax.f32 %v1347_v51, 0.0  ;;  %v1865_v56 = vmax.f32 %v1603_v52, 0.0 }
 0x151   : > { %v1351_v58 = vpop.f32.mrf.mxu0  ;;  %v1607_v59 = vpop.f32.mrf.mxu1 }
 0x152   : > { %v3021_v60 = vpack.c.bf16 %v1801_v55, %v1801_v55  ;;  %v3085_v61 = vpack.c.bf16 %v1865_v56, %v1865_v56  ;;  %v1352_v62 = vadd.f32 %v3664_v57, %v1351_v58  ;;  %v1608_v63 = vadd.f32 %v3664_v57, %v1607_v59 }
 0x153   : > { %v1353_v0 = vpop.f32.mrf.mxu0  ;;  %v1609_v1 = vpop.f32.mrf.mxu1 }
 0x154   : > { %2442 = vst.msk [vmem:[%s3678_s20 + $0x4c] sm:$0xf] %vm2422_vm2, %v3021_v60  ;;  %2506 = vst.msk [vmem:[%s3678_s20 + $0x14c] sm:$0xf] %vm2422_vm2, %v3085_v61  ;;  %v1802_v2 = vmax.f32 %v1352_v62, 0.0  ;;  %v1866_v3 = vmax.f32 %v1608_v63, 0.0 }
 0x155   : > { %v1354_v4 = vpop.f32.mrf.mxu0  ;;  %v1610_v5 = vpop.f32.mrf.mxu1 }
 0x156   : > { %v3022_v6 = vpack.c.bf16 %v1802_v2, %v1802_v2  ;;  %v3086_v7 = vpack.c.bf16 %v1866_v3, %v1866_v3  ;;  %v1355_v8 = vadd.f32 %v3664_v57, %v1354_v4  ;;  %v1611_v9 = vadd.f32 %v3664_v57, %v1610_v5 }
 0x157   : > { %v1356_v10 = vpop.f32.mrf.mxu0  ;;  %v1612_v11 = vpop.f32.mrf.mxu1 }
 0x158   : > { %2443 = vst.msk [vmem:[%s3678_s20 + $0x50] sm:$0xf] %vm2422_vm2, %v3022_v6  ;;  %2507 = vst.msk [vmem:[%s3678_s20 + $0x150] sm:$0xf] %vm2422_vm2, %v3086_v7  ;;  %v1803_v12 = vmax.f32 %v1355_v8, 0.0  ;;  %v1867_v13 = vmax.f32 %v1611_v9, 0.0 }
 0x159   : > { %v1359_v14 = vpop.f32.mrf.mxu0  ;;  %v1615_v15 = vpop.f32.mrf.mxu1 }
 0x15a   : > { %v3023_v16 = vpack.c.bf16 %v1803_v12, %v1803_v12  ;;  %v3087_v17 = vpack.c.bf16 %v1867_v13, %v1867_v13  ;;  %v1360_v18 = vadd.f32 %v3664_v57, %v1359_v14  ;;  %v1616_v19 = vadd.f32 %v3664_v57, %v1615_v15 }
 0x15b   : > { %v1361_v20 = vpop.f32.mrf.mxu0  ;;  %v1617_v21 = vpop.f32.mrf.mxu1 }
 0x15c   : > { %2444 = vst.msk [vmem:[%s3678_s20 + $0x54] sm:$0xf] %vm2422_vm2, %v3023_v16  ;;  %2508 = vst.msk [vmem:[%s3678_s20 + $0x154] sm:$0xf] %vm2422_vm2, %v3087_v17  ;;  %v1804_v22 = vmax.f32 %v1360_v18, 0.0  ;;  %v1868_v23 = vmax.f32 %v1616_v19, 0.0 }
 0x15d   : > { %v1362_v24 = vpop.f32.mrf.mxu0  ;;  %v1618_v25 = vpop.f32.mrf.mxu1 }
 0x15e   : > { %v3024_v26 = vpack.c.bf16 %v1804_v22, %v1804_v22  ;;  %v3088_v27 = vpack.c.bf16 %v1868_v23, %v1868_v23  ;;  %v1363_v28 = vadd.f32 %v3664_v57, %v1362_v24  ;;  %v1619_v29 = vadd.f32 %v3664_v57, %v1618_v25 }
 0x15f   : > { %v1364_v30 = vpop.f32.mrf.mxu0  ;;  %v1620_v31 = vpop.f32.mrf.mxu1 }
 0x160   : > { %2445 = vst.msk [vmem:[%s3678_s20 + $0x58] sm:$0xf] %vm2422_vm2, %v3024_v26  ;;  %2509 = vst.msk [vmem:[%s3678_s20 + $0x158] sm:$0xf] %vm2422_vm2, %v3088_v27  ;;  %v1805_v32 = vmax.f32 %v1363_v28, 0.0  ;;  %v1869_v33 = vmax.f32 %v1619_v29, 0.0 }
 0x161   : > { %v1367_v34 = vpop.f32.mrf.mxu0  ;;  %v1623_v35 = vpop.f32.mrf.mxu1 }
 0x162   : > { %v3025_v36 = vpack.c.bf16 %v1805_v32, %v1805_v32  ;;  %v3089_v37 = vpack.c.bf16 %v1869_v33, %v1869_v33  ;;  %v1368_v38 = vadd.f32 %v3664_v57, %v1367_v34  ;;  %v1624_v39 = vadd.f32 %v3664_v57, %v1623_v35 }
 0x163   : > { %v1369_v40 = vpop.f32.mrf.mxu0  ;;  %v1625_v41 = vpop.f32.mrf.mxu1 }
 0x164   : > { %2446 = vst.msk [vmem:[%s3678_s20 + $0x5c] sm:$0xf] %vm2422_vm2, %v3025_v36  ;;  %2510 = vst.msk [vmem:[%s3678_s20 + $0x15c] sm:$0xf] %vm2422_vm2, %v3089_v37  ;;  %v1806_v42 = vmax.f32 %v1368_v38, 0.0  ;;  %v1870_v43 = vmax.f32 %v1624_v39, 0.0 }
 0x165   : > { %v1370_v44 = vpop.f32.mrf.mxu0  ;;  %v1626_v45 = vpop.f32.mrf.mxu1 }
 0x166   : > { %v3026_v46 = vpack.c.bf16 %v1806_v42, %v1806_v42  ;;  %v3090_v47 = vpack.c.bf16 %v1870_v43, %v1870_v43  ;;  %v1371_v48 = vadd.f32 %v3664_v57, %v1370_v44  ;;  %v1627_v49 = vadd.f32 %v3664_v57, %v1626_v45 }
 0x167   : > { %v1372_v50 = vpop.f32.mrf.mxu0  ;;  %v1628_v51 = vpop.f32.mrf.mxu1 }
 0x168   : > { %2447 = vst.msk [vmem:[%s3678_s20 + $0x60] sm:$0xf] %vm2422_vm2, %v3026_v46  ;;  %2511 = vst.msk [vmem:[%s3678_s20 + $0x160] sm:$0xf] %vm2422_vm2, %v3090_v47  ;;  %v1807_v52 = vmax.f32 %v1371_v48, 0.0  ;;  %v1871_v53 = vmax.f32 %v1627_v49, 0.0 }
 0x169   : > { %v1375_v54 = vpop.f32.mrf.mxu0  ;;  %v1631_v55 = vpop.f32.mrf.mxu1 }
 0x16a   : > { %v3027_v56 = vpack.c.bf16 %v1807_v52, %v1807_v52  ;;  %v3091_v58 = vpack.c.bf16 %v1871_v53, %v1871_v53  ;;  %v1376_v59 = vadd.f32 %v3664_v57, %v1375_v54  ;;  %v1632_v60 = vadd.f32 %v3664_v57, %v1631_v55 }
 0x16b   : > { %v1377_v61 = vpop.f32.mrf.mxu0  ;;  %v1633_v62 = vpop.f32.mrf.mxu1 }
 0x16c   : > { %2448 = vst.msk [vmem:[%s3678_s20 + $0x64] sm:$0xf] %vm2422_vm2, %v3027_v56  ;;  %2512 = vst.msk [vmem:[%s3678_s20 + $0x164] sm:$0xf] %vm2422_vm2, %v3091_v58  ;;  %v1808_v63 = vmax.f32 %v1376_v59, 0.0  ;;  %v1872_v0 = vmax.f32 %v1632_v60, 0.0 }
 0x16d   : > { %v1378_v1 = vpop.f32.mrf.mxu0  ;;  %v1634_v2 = vpop.f32.mrf.mxu1 }
 0x16e   : > { %v3028_v3 = vpack.c.bf16 %v1808_v63, %v1808_v63  ;;  %v3092_v4 = vpack.c.bf16 %v1872_v0, %v1872_v0  ;;  %v1379_v5 = vadd.f32 %v3664_v57, %v1378_v1  ;;  %v1635_v6 = vadd.f32 %v3664_v57, %v1634_v2 }
 0x16f   : > { %v1380_v7 = vpop.f32.mrf.mxu0  ;;  %v1636_v8 = vpop.f32.mrf.mxu1 }
 0x170   : > { %2449 = vst.msk [vmem:[%s3678_s20 + $0x68] sm:$0xf] %vm2422_vm2, %v3028_v3  ;;  %2513 = vst.msk [vmem:[%s3678_s20 + $0x168] sm:$0xf] %vm2422_vm2, %v3092_v4  ;;  %v1809_v9 = vmax.f32 %v1379_v5, 0.0  ;;  %v1873_v10 = vmax.f32 %v1635_v6, 0.0 }
 0x171   : > { %v1383_v11 = vpop.f32.mrf.mxu0  ;;  %v1639_v12 = vpop.f32.mrf.mxu1 }
 0x172   : > { %v3029_v13 = vpack.c.bf16 %v1809_v9, %v1809_v9  ;;  %v3093_v14 = vpack.c.bf16 %v1873_v10, %v1873_v10  ;;  %v1384_v15 = vadd.f32 %v3664_v57, %v1383_v11  ;;  %v1640_v16 = vadd.f32 %v3664_v57, %v1639_v12 }
 0x173   : > { %v1385_v17 = vpop.f32.mrf.mxu0  ;;  %v1641_v18 = vpop.f32.mrf.mxu1 }
 0x174   : > { %2450 = vst.msk [vmem:[%s3678_s20 + $0x6c] sm:$0xf] %vm2422_vm2, %v3029_v13  ;;  %2514 = vst.msk [vmem:[%s3678_s20 + $0x16c] sm:$0xf] %vm2422_vm2, %v3093_v14  ;;  %v1810_v19 = vmax.f32 %v1384_v15, 0.0  ;;  %v1874_v20 = vmax.f32 %v1640_v16, 0.0 }
 0x175   : > { %v1386_v21 = vpop.f32.mrf.mxu0  ;;  %v1642_v22 = vpop.f32.mrf.mxu1 }
 0x176   : > { %v3030_v23 = vpack.c.bf16 %v1810_v19, %v1810_v19  ;;  %v3094_v24 = vpack.c.bf16 %v1874_v20, %v1874_v20  ;;  %v1387_v25 = vadd.f32 %v3664_v57, %v1386_v21  ;;  %v1643_v26 = vadd.f32 %v3664_v57, %v1642_v22 }
 0x177   : > { %v1388_v27 = vpop.f32.mrf.mxu0  ;;  %v1644_v28 = vpop.f32.mrf.mxu1 }
 0x178   : > { %2451 = vst.msk [vmem:[%s3678_s20 + $0x70] sm:$0xf] %vm2422_vm2, %v3030_v23  ;;  %2515 = vst.msk [vmem:[%s3678_s20 + $0x170] sm:$0xf] %vm2422_vm2, %v3094_v24  ;;  %v1811_v29 = vmax.f32 %v1387_v25, 0.0  ;;  %v1875_v30 = vmax.f32 %v1643_v26, 0.0 }
 0x179   : > { %v1391_v31 = vpop.f32.mrf.mxu0  ;;  %v1647_v32 = vpop.f32.mrf.mxu1 }
 0x17a   : > { %v3031_v33 = vpack.c.bf16 %v1811_v29, %v1811_v29  ;;  %v3095_v34 = vpack.c.bf16 %v1875_v30, %v1875_v30  ;;  %v1392_v35 = vadd.f32 %v3664_v57, %v1391_v31  ;;  %v1648_v36 = vadd.f32 %v3664_v57, %v1647_v32  ;;  %v3941_v32 = vld [vmem:[%s4126_s2] ss:$0 sm:$0xff] }
 0x17b   : > { %v1393_v37 = vpop.f32.mrf.mxu0  ;;  %v1649_v38 = vpop.f32.mrf.mxu1 }
 0x17c   : > { %2452 = vst.msk [vmem:[%s3678_s20 + $0x74] sm:$0xf] %vm2422_vm2, %v3031_v33  ;;  %2516 = vst.msk [vmem:[%s3678_s20 + $0x174] sm:$0xf] %vm2422_vm2, %v3095_v34  ;;  %v1812_v39 = vmax.f32 %v1392_v35, 0.0  ;;  %v1876_v40 = vmax.f32 %v1648_v36, 0.0 }
 0x17d   : > { %v1394_v41 = vpop.f32.mrf.mxu0  ;;  %v1650_v42 = vpop.f32.mrf.mxu1 }
 0x17e   : > { %v3032_v43 = vpack.c.bf16 %v1812_v39, %v1812_v39  ;;  %v3096_v44 = vpack.c.bf16 %v1876_v40, %v1876_v40  ;;  %v1395_v45 = vadd.f32 %v3664_v57, %v1394_v41  ;;  %v1651_v46 = vadd.f32 %v3664_v57, %v1650_v42 }
 0x17f   : > { %v1396_v47 = vpop.f32.mrf.mxu0  ;;  %v1652_v48 = vpop.f32.mrf.mxu1 }
 0x180   : > { %2453 = vst.msk [vmem:[%s3678_s20 + $0x78] sm:$0xf] %vm2422_vm2, %v3032_v43  ;;  %2517 = vst.msk [vmem:[%s3678_s20 + $0x178] sm:$0xf] %vm2422_vm2, %v3096_v44  ;;  %v1813_v49 = vmax.f32 %v1395_v45, 0.0  ;;  %v1877_v50 = vmax.f32 %v1651_v46, 0.0 }
 0x181   : > { %v1399_v51 = vpop.f32.mrf.mxu0  ;;  %v1655_v52 = vpop.f32.mrf.mxu1 }
 0x182   : > { %v3033_v53 = vpack.c.bf16 %v1813_v49, %v1813_v49  ;;  %v3097_v54 = vpack.c.bf16 %v1877_v50, %v1877_v50  ;;  %v1400_v55 = vadd.f32 %v3664_v57, %v1399_v51  ;;  %v1656_v56 = vadd.f32 %v3664_v57, %v1655_v52 }
 0x183   : > { %v1401_v58 = vpop.f32.mrf.mxu0  ;;  %v1657_v59 = vpop.f32.mrf.mxu1 }
 0x184   : > { %2454 = vst.msk [vmem:[%s3678_s20 + $0x7c] sm:$0xf] %vm2422_vm2, %v3033_v53  ;;  %2518 = vst.msk [vmem:[%s3678_s20 + $0x17c] sm:$0xf] %vm2422_vm2, %v3097_v54  ;;  %v1814_v60 = vmax.f32 %v1400_v55, 0.0  ;;  %v1878_v61 = vmax.f32 %v1656_v56, 0.0 }
 0x185   : > { %v1402_v62 = vpop.f32.mrf.mxu0  ;;  %v1658_v63 = vpop.f32.mrf.mxu1 }
 0x186   : > { %v3034_v0 = vpack.c.bf16 %v1814_v60, %v1814_v60  ;;  %v3098_v1 = vpack.c.bf16 %v1878_v61, %v1878_v61  ;;  %v1403_v2 = vadd.f32 %v3664_v57, %v1402_v62  ;;  %v1659_v3 = vadd.f32 %v3664_v57, %v1658_v63 }
 0x187   : > { %v1404_v4 = vpop.f32.mrf.mxu0  ;;  %v1660_v5 = vpop.f32.mrf.mxu1 }
 0x188   : > { %2455 = vst.msk [vmem:[%s3678_s20 + $0x80] sm:$0xf] %vm2422_vm2, %v3034_v0  ;;  %2519 = vst.msk [vmem:[%s3678_s20 + $0x180] sm:$0xf] %vm2422_vm2, %v3098_v1  ;;  %v1815_v6 = vmax.f32 %v1403_v2, 0.0  ;;  %v1879_v7 = vmax.f32 %v1659_v3, 0.0 }
 0x189   : > { %v1407_v8 = vpop.f32.mrf.mxu0  ;;  %v1663_v9 = vpop.f32.mrf.mxu1 }
 0x18a   : > { %v3035_v10 = vpack.c.bf16 %v1815_v6, %v1815_v6  ;;  %v3099_v11 = vpack.c.bf16 %v1879_v7, %v1879_v7  ;;  %v1408_v12 = vadd.f32 %v3664_v57, %v1407_v8  ;;  %v1664_v13 = vadd.f32 %v3664_v57, %v1663_v9 }
 0x18b   : > { %v1409_v14 = vpop.f32.mrf.mxu0  ;;  %v1665_v15 = vpop.f32.mrf.mxu1 }
 0x18c   : > { %2456 = vst.msk [vmem:[%s3678_s20 + $0x84] sm:$0xf] %vm2422_vm2, %v3035_v10  ;;  %2520 = vst.msk [vmem:[%s3678_s20 + $0x184] sm:$0xf] %vm2422_vm2, %v3099_v11  ;;  %v1816_v16 = vmax.f32 %v1408_v12, 0.0  ;;  %v1880_v17 = vmax.f32 %v1664_v13, 0.0 }
 0x18d   : > { %v1410_v18 = vpop.f32.mrf.mxu0  ;;  %v1666_v19 = vpop.f32.mrf.mxu1 }
 0x18e   : > { %v3036_v20 = vpack.c.bf16 %v1816_v16, %v1816_v16  ;;  %v3100_v21 = vpack.c.bf16 %v1880_v17, %v1880_v17  ;;  %v1411_v22 = vadd.f32 %v3664_v57, %v1410_v18  ;;  %v1667_v23 = vadd.f32 %v3664_v57, %v1666_v19 }
 0x18f   : > { %v1412_v24 = vpop.f32.mrf.mxu0  ;;  %v1668_v25 = vpop.f32.mrf.mxu1 }
 0x190   : > { %2457 = vst.msk [vmem:[%s3678_s20 + $0x88] sm:$0xf] %vm2422_vm2, %v3036_v20  ;;  %2521 = vst.msk [vmem:[%s3678_s20 + $0x188] sm:$0xf] %vm2422_vm2, %v3100_v21  ;;  %v1817_v26 = vmax.f32 %v1411_v22, 0.0  ;;  %v1881_v27 = vmax.f32 %v1667_v23, 0.0 }
 0x191   : > { %v1415_v28 = vpop.f32.mrf.mxu0  ;;  %v1671_v29 = vpop.f32.mrf.mxu1 }
 0x192   : > { %v3037_v30 = vpack.c.bf16 %v1817_v26, %v1817_v26  ;;  %v3101_v31 = vpack.c.bf16 %v1881_v27, %v1881_v27  ;;  %v1416_v57 = vadd.f32 %v3941_v32, %v1415_v28  ;;  %v1672_v33 = vadd.f32 %v3941_v32, %v1671_v29 }
 0x193   : > { %v1417_v34 = vpop.f32.mrf.mxu0  ;;  %v1673_v35 = vpop.f32.mrf.mxu1 }
 0x194   : > { %2458 = vst.msk [vmem:[%s3678_s20 + $0x8c] sm:$0xf] %vm2422_vm2, %v3037_v30  ;;  %2522 = vst.msk [vmem:[%s3678_s20 + $0x18c] sm:$0xf] %vm2422_vm2, %v3101_v31  ;;  %v1818_v36 = vmax.f32 %v1416_v57, 0.0  ;;  %v1882_v37 = vmax.f32 %v1672_v33, 0.0 }
 0x195   : > { %v1418_v38 = vpop.f32.mrf.mxu0  ;;  %v1674_v39 = vpop.f32.mrf.mxu1 }
 0x196   : > { %v3038_v40 = vpack.c.bf16 %v1818_v36, %v1818_v36  ;;  %v3102_v41 = vpack.c.bf16 %v1882_v37, %v1882_v37  ;;  %v1419_v42 = vadd.f32 %v3941_v32, %v1418_v38  ;;  %v1675_v43 = vadd.f32 %v3941_v32, %v1674_v39 }
 0x197   : > { %v1420_v44 = vpop.f32.mrf.mxu0  ;;  %v1676_v45 = vpop.f32.mrf.mxu1 }
 0x198   : > { %2459 = vst.msk [vmem:[%s3678_s20 + $0x90] sm:$0xf] %vm2422_vm2, %v3038_v40  ;;  %2523 = vst.msk [vmem:[%s3678_s20 + $0x190] sm:$0xf] %vm2422_vm2, %v3102_v41  ;;  %v1819_v46 = vmax.f32 %v1419_v42, 0.0  ;;  %v1883_v47 = vmax.f32 %v1675_v43, 0.0 }
 0x199   : > { %v1423_v48 = vpop.f32.mrf.mxu0  ;;  %v1679_v49 = vpop.f32.mrf.mxu1 }
 0x19a   : > { %v3039_v50 = vpack.c.bf16 %v1819_v46, %v1819_v46  ;;  %v3103_v51 = vpack.c.bf16 %v1883_v47, %v1883_v47  ;;  %v1424_v52 = vadd.f32 %v3941_v32, %v1423_v48  ;;  %v1680_v53 = vadd.f32 %v3941_v32, %v1679_v49 }
 0x19b   : > { %v1425_v54 = vpop.f32.mrf.mxu0  ;;  %v1681_v55 = vpop.f32.mrf.mxu1 }
 0x19c   : > { %2460 = vst.msk [vmem:[%s3678_s20 + $0x94] sm:$0xf] %vm2422_vm2, %v3039_v50  ;;  %2524 = vst.msk [vmem:[%s3678_s20 + $0x194] sm:$0xf] %vm2422_vm2, %v3103_v51  ;;  %v1820_v56 = vmax.f32 %v1424_v52, 0.0  ;;  %v1884_v58 = vmax.f32 %v1680_v53, 0.0 }
 0x19d   : > { %v1426_v59 = vpop.f32.mrf.mxu0  ;;  %v1682_v60 = vpop.f32.mrf.mxu1 }
 0x19e   : > { %v3040_v61 = vpack.c.bf16 %v1820_v56, %v1820_v56  ;;  %v3104_v62 = vpack.c.bf16 %v1884_v58, %v1884_v58  ;;  %v1427_v63 = vadd.f32 %v3941_v32, %v1426_v59  ;;  %v1683_v0 = vadd.f32 %v3941_v32, %v1682_v60 }
 0x19f   : > { %v1428_v1 = vpop.f32.mrf.mxu0  ;;  %v1684_v2 = vpop.f32.mrf.mxu1 }
 0x1a0   : > { %2461 = vst.msk [vmem:[%s3678_s20 + $0x98] sm:$0xf] %vm2422_vm2, %v3040_v61  ;;  %2525 = vst.msk [vmem:[%s3678_s20 + $0x198] sm:$0xf] %vm2422_vm2, %v3104_v62  ;;  %v1821_v3 = vmax.f32 %v1427_v63, 0.0  ;;  %v1885_v4 = vmax.f32 %v1683_v0, 0.0 }
 0x1a1   : > { %v1431_v5 = vpop.f32.mrf.mxu0  ;;  %v1687_v6 = vpop.f32.mrf.mxu1 }
 0x1a2   : > { %v3041_v7 = vpack.c.bf16 %v1821_v3, %v1821_v3  ;;  %v3105_v8 = vpack.c.bf16 %v1885_v4, %v1885_v4  ;;  %v1432_v9 = vadd.f32 %v3941_v32, %v1431_v5  ;;  %v1688_v10 = vadd.f32 %v3941_v32, %v1687_v6 }
 0x1a3   : > { %v1433_v11 = vpop.f32.mrf.mxu0  ;;  %v1689_v12 = vpop.f32.mrf.mxu1 }
 0x1a4   : > { %2462 = vst.msk [vmem:[%s3678_s20 + $0x9c] sm:$0xf] %vm2422_vm2, %v3041_v7  ;;  %2526 = vst.msk [vmem:[%s3678_s20 + $0x19c] sm:$0xf] %vm2422_vm2, %v3105_v8  ;;  %v1822_v13 = vmax.f32 %v1432_v9, 0.0  ;;  %v1886_v14 = vmax.f32 %v1688_v10, 0.0 }
 0x1a5   : > { %v1434_v15 = vpop.f32.mrf.mxu0  ;;  %v1690_v16 = vpop.f32.mrf.mxu1 }
 0x1a6   : > { %v3042_v17 = vpack.c.bf16 %v1822_v13, %v1822_v13  ;;  %v3106_v18 = vpack.c.bf16 %v1886_v14, %v1886_v14  ;;  %v1435_v19 = vadd.f32 %v3941_v32, %v1434_v15  ;;  %v1691_v20 = vadd.f32 %v3941_v32, %v1690_v16 }
 0x1a7   : > { %v1436_v21 = vpop.f32.mrf.mxu0  ;;  %v1692_v22 = vpop.f32.mrf.mxu1 }
 0x1a8   : > { %2463 = vst.msk [vmem:[%s3678_s20 + $0xa0] sm:$0xf] %vm2422_vm2, %v3042_v17  ;;  %2527 = vst.msk [vmem:[%s3678_s20 + $0x1a0] sm:$0xf] %vm2422_vm2, %v3106_v18  ;;  %v1823_v23 = vmax.f32 %v1435_v19, 0.0  ;;  %v1887_v24 = vmax.f32 %v1691_v20, 0.0 }
 0x1a9   : > { %v1439_v25 = vpop.f32.mrf.mxu0  ;;  %v1695_v26 = vpop.f32.mrf.mxu1 }
 0x1aa   : > { %v3043_v27 = vpack.c.bf16 %v1823_v23, %v1823_v23  ;;  %v3107_v28 = vpack.c.bf16 %v1887_v24, %v1887_v24  ;;  %v1440_v29 = vadd.f32 %v3941_v32, %v1439_v25  ;;  %v1696_v30 = vadd.f32 %v3941_v32, %v1695_v26 }
 0x1ab   : > { %v1441_v31 = vpop.f32.mrf.mxu0  ;;  %v1697_v57 = vpop.f32.mrf.mxu1 }
 0x1ac   : > { %2464 = vst.msk [vmem:[%s3678_s20 + $0xa4] sm:$0xf] %vm2422_vm2, %v3043_v27  ;;  %2528 = vst.msk [vmem:[%s3678_s20 + $0x1a4] sm:$0xf] %vm2422_vm2, %v3107_v28  ;;  %v1824_v33 = vmax.f32 %v1440_v29, 0.0  ;;  %v1888_v34 = vmax.f32 %v1696_v30, 0.0 }
 0x1ad   : > { %v1442_v35 = vpop.f32.mrf.mxu0  ;;  %v1698_v36 = vpop.f32.mrf.mxu1 }
 0x1ae   : > { %v3044_v37 = vpack.c.bf16 %v1824_v33, %v1824_v33  ;;  %v3108_v38 = vpack.c.bf16 %v1888_v34, %v1888_v34  ;;  %v1443_v39 = vadd.f32 %v3941_v32, %v1442_v35  ;;  %v1699_v40 = vadd.f32 %v3941_v32, %v1698_v36 }
 0x1af   : > { %v1444_v41 = vpop.f32.mrf.mxu0  ;;  %v1700_v42 = vpop.f32.mrf.mxu1 }
 0x1b0   : > { %2465 = vst.msk [vmem:[%s3678_s20 + $0xa8] sm:$0xf] %vm2422_vm2, %v3044_v37  ;;  %2529 = vst.msk [vmem:[%s3678_s20 + $0x1a8] sm:$0xf] %vm2422_vm2, %v3108_v38  ;;  %v1825_v43 = vmax.f32 %v1443_v39, 0.0  ;;  %v1889_v44 = vmax.f32 %v1699_v40, 0.0 }
 0x1b1   : > { %v1447_v45 = vpop.f32.mrf.mxu0  ;;  %v1703_v46 = vpop.f32.mrf.mxu1 }
 0x1b2   : > { %v3045_v47 = vpack.c.bf16 %v1825_v43, %v1825_v43  ;;  %v3109_v48 = vpack.c.bf16 %v1889_v44, %v1889_v44  ;;  %v1448_v49 = vadd.f32 %v3941_v32, %v1447_v45  ;;  %v1704_v50 = vadd.f32 %v3941_v32, %v1703_v46 }
 0x1b3   : > { %v1449_v51 = vpop.f32.mrf.mxu0  ;;  %v1705_v52 = vpop.f32.mrf.mxu1 }
 0x1b4   : > { %2466 = vst.msk [vmem:[%s3678_s20 + $0xac] sm:$0xf] %vm2422_vm2, %v3045_v47  ;;  %2530 = vst.msk [vmem:[%s3678_s20 + $0x1ac] sm:$0xf] %vm2422_vm2, %v3109_v48  ;;  %v1826_v53 = vmax.f32 %v1448_v49, 0.0  ;;  %v1890_v54 = vmax.f32 %v1704_v50, 0.0 }
 0x1b5   : > { %v1450_v55 = vpop.f32.mrf.mxu0  ;;  %v1706_v56 = vpop.f32.mrf.mxu1 }
 0x1b6   : > { %v3046_v58 = vpack.c.bf16 %v1826_v53, %v1826_v53  ;;  %v3110_v59 = vpack.c.bf16 %v1890_v54, %v1890_v54  ;;  %v1451_v60 = vadd.f32 %v3941_v32, %v1450_v55  ;;  %v1707_v61 = vadd.f32 %v3941_v32, %v1706_v56 }
 0x1b7   : > { %v1452_v62 = vpop.f32.mrf.mxu0  ;;  %v1708_v63 = vpop.f32.mrf.mxu1 }
 0x1b8   : > { %2467 = vst.msk [vmem:[%s3678_s20 + $0xb0] sm:$0xf] %vm2422_vm2, %v3046_v58  ;;  %2531 = vst.msk [vmem:[%s3678_s20 + $0x1b0] sm:$0xf] %vm2422_vm2, %v3110_v59  ;;  %v1827_v0 = vmax.f32 %v1451_v60, 0.0  ;;  %v1891_v1 = vmax.f32 %v1707_v61, 0.0 }
 0x1b9   : > { %v1455_v2 = vpop.f32.mrf.mxu0  ;;  %v1711_v3 = vpop.f32.mrf.mxu1 }
 0x1ba   : > { %v3047_v4 = vpack.c.bf16 %v1827_v0, %v1827_v0  ;;  %v3111_v5 = vpack.c.bf16 %v1891_v1, %v1891_v1  ;;  %v1456_v6 = vadd.f32 %v3941_v32, %v1455_v2  ;;  %v1712_v7 = vadd.f32 %v3941_v32, %v1711_v3 }
 0x1bb   : > { %v1457_v8 = vpop.f32.mrf.mxu0  ;;  %v1713_v9 = vpop.f32.mrf.mxu1 }
 0x1bc   : > { %2468 = vst.msk [vmem:[%s3678_s20 + $0xb4] sm:$0xf] %vm2422_vm2, %v3047_v4  ;;  %2532 = vst.msk [vmem:[%s3678_s20 + $0x1b4] sm:$0xf] %vm2422_vm2, %v3111_v5  ;;  %v1828_v10 = vmax.f32 %v1456_v6, 0.0  ;;  %v1892_v11 = vmax.f32 %v1712_v7, 0.0 }
 0x1bd   : > { %v1458_v12 = vpop.f32.mrf.mxu0  ;;  %v1714_v13 = vpop.f32.mrf.mxu1 }
 0x1be   : > { %v3048_v14 = vpack.c.bf16 %v1828_v10, %v1828_v10  ;;  %v3112_v15 = vpack.c.bf16 %v1892_v11, %v1892_v11  ;;  %v1459_v16 = vadd.f32 %v3941_v32, %v1458_v12  ;;  %v1715_v17 = vadd.f32 %v3941_v32, %v1714_v13 }
 0x1bf   : > { %v1460_v18 = vpop.f32.mrf.mxu0  ;;  %v1716_v19 = vpop.f32.mrf.mxu1 }
 0x1c0   : > { %2469 = vst.msk [vmem:[%s3678_s20 + $0xb8] sm:$0xf] %vm2422_vm2, %v3048_v14  ;;  %2533 = vst.msk [vmem:[%s3678_s20 + $0x1b8] sm:$0xf] %vm2422_vm2, %v3112_v15  ;;  %v1829_v20 = vmax.f32 %v1459_v16, 0.0  ;;  %v1893_v21 = vmax.f32 %v1715_v17, 0.0 }
 0x1c1   : > { %v1463_v22 = vpop.f32.mrf.mxu0  ;;  %v1719_v23 = vpop.f32.mrf.mxu1 }
 0x1c2   : > { %v3049_v24 = vpack.c.bf16 %v1829_v20, %v1829_v20  ;;  %v3113_v25 = vpack.c.bf16 %v1893_v21, %v1893_v21  ;;  %v1464_v26 = vadd.f32 %v3941_v32, %v1463_v22  ;;  %v1720_v27 = vadd.f32 %v3941_v32, %v1719_v23 }
 0x1c3   : > { %v1465_v28 = vpop.f32.mrf.mxu0  ;;  %v1721_v29 = vpop.f32.mrf.mxu1 }
 0x1c4   : > { %2470 = vst.msk [vmem:[%s3678_s20 + $0xbc] sm:$0xf] %vm2422_vm2, %v3049_v24  ;;  %2534 = vst.msk [vmem:[%s3678_s20 + $0x1bc] sm:$0xf] %vm2422_vm2, %v3113_v25  ;;  %v1830_v30 = vmax.f32 %v1464_v26, 0.0  ;;  %v1894_v31 = vmax.f32 %v1720_v27, 0.0 }
 0x1c5   : > { %v1466_v57 = vpop.f32.mrf.mxu0  ;;  %v1722_v33 = vpop.f32.mrf.mxu1 }
 0x1c6   : > { %v3050_v34 = vpack.c.bf16 %v1830_v30, %v1830_v30  ;;  %v3114_v35 = vpack.c.bf16 %v1894_v31, %v1894_v31  ;;  %v1467_v36 = vadd.f32 %v3941_v32, %v1466_v57  ;;  %v1723_v37 = vadd.f32 %v3941_v32, %v1722_v33 }
 0x1c7   : > { %v1468_v38 = vpop.f32.mrf.mxu0  ;;  %v1724_v39 = vpop.f32.mrf.mxu1 }
 0x1c8   : > { %2471 = vst.msk [vmem:[%s3678_s20 + $0xc0] sm:$0xf] %vm2422_vm2, %v3050_v34  ;;  %2535 = vst.msk [vmem:[%s3678_s20 + $0x1c0] sm:$0xf] %vm2422_vm2, %v3114_v35  ;;  %v1831_v40 = vmax.f32 %v1467_v36, 0.0  ;;  %v1895_v41 = vmax.f32 %v1723_v37, 0.0 }
 0x1c9   : > { %v1471_v42 = vpop.f32.mrf.mxu0  ;;  %v1727_v43 = vpop.f32.mrf.mxu1 }
 0x1ca   : > { %v3051_v44 = vpack.c.bf16 %v1831_v40, %v1831_v40  ;;  %v3115_v45 = vpack.c.bf16 %v1895_v41, %v1895_v41  ;;  %v1472_v46 = vadd.f32 %v3941_v32, %v1471_v42  ;;  %v1728_v47 = vadd.f32 %v3941_v32, %v1727_v43 }
 0x1cb   : > { %v1473_v48 = vpop.f32.mrf.mxu0  ;;  %v1729_v49 = vpop.f32.mrf.mxu1 }
 0x1cc   : > { %2472 = vst.msk [vmem:[%s3678_s20 + $0xc4] sm:$0xf] %vm2422_vm2, %v3051_v44  ;;  %2536 = vst.msk [vmem:[%s3678_s20 + $0x1c4] sm:$0xf] %vm2422_vm2, %v3115_v45  ;;  %v1832_v50 = vmax.f32 %v1472_v46, 0.0  ;;  %v1896_v51 = vmax.f32 %v1728_v47, 0.0 }
 0x1cd   : > { %v1474_v52 = vpop.f32.mrf.mxu0  ;;  %v1730_v53 = vpop.f32.mrf.mxu1 }
 0x1ce   : > { %v3052_v54 = vpack.c.bf16 %v1832_v50, %v1832_v50  ;;  %v3116_v55 = vpack.c.bf16 %v1896_v51, %v1896_v51  ;;  %v1475_v56 = vadd.f32 %v3941_v32, %v1474_v52  ;;  %v1731_v58 = vadd.f32 %v3941_v32, %v1730_v53 }
 0x1cf   : > { %v1476_v59 = vpop.f32.mrf.mxu0  ;;  %v1732_v60 = vpop.f32.mrf.mxu1 }
 0x1d0   : > { %2473 = vst.msk [vmem:[%s3678_s20 + $0xc8] sm:$0xf] %vm2422_vm2, %v3052_v54  ;;  %2537 = vst.msk [vmem:[%s3678_s20 + $0x1c8] sm:$0xf] %vm2422_vm2, %v3116_v55  ;;  %v1833_v61 = vmax.f32 %v1475_v56, 0.0  ;;  %v1897_v62 = vmax.f32 %v1731_v58, 0.0 }
 0x1d1   : > { %v1479_v63 = vpop.f32.mrf.mxu0  ;;  %v1735_v0 = vpop.f32.mrf.mxu1 }
 0x1d2   : > { %v3053_v1 = vpack.c.bf16 %v1833_v61, %v1833_v61  ;;  %v3117_v2 = vpack.c.bf16 %v1897_v62, %v1897_v62  ;;  %v1480_v3 = vadd.f32 %v3941_v32, %v1479_v63  ;;  %v1736_v4 = vadd.f32 %v3941_v32, %v1735_v0 }
 0x1d3   : > { %v1481_v5 = vpop.f32.mrf.mxu0  ;;  %v1737_v6 = vpop.f32.mrf.mxu1 }
 0x1d4   : > { %2474 = vst.msk [vmem:[%s3678_s20 + $0xcc] sm:$0xf] %vm2422_vm2, %v3053_v1  ;;  %2538 = vst.msk [vmem:[%s3678_s20 + $0x1cc] sm:$0xf] %vm2422_vm2, %v3117_v2  ;;  %v1834_v7 = vmax.f32 %v1480_v3, 0.0  ;;  %v1898_v8 = vmax.f32 %v1736_v4, 0.0 }
 0x1d5   : > { %v1482_v9 = vpop.f32.mrf.mxu0  ;;  %v1738_v10 = vpop.f32.mrf.mxu1 }
 0x1d6   : > { %v3054_v11 = vpack.c.bf16 %v1834_v7, %v1834_v7  ;;  %v3118_v12 = vpack.c.bf16 %v1898_v8, %v1898_v8  ;;  %v1483_v13 = vadd.f32 %v3941_v32, %v1482_v9  ;;  %v1739_v14 = vadd.f32 %v3941_v32, %v1738_v10 }
 0x1d7   : > { %v1484_v15 = vpop.f32.mrf.mxu0  ;;  %v1740_v16 = vpop.f32.mrf.mxu1 }
 0x1d8   : > { %2475 = vst.msk [vmem:[%s3678_s20 + $0xd0] sm:$0xf] %vm2422_vm2, %v3054_v11  ;;  %2539 = vst.msk [vmem:[%s3678_s20 + $0x1d0] sm:$0xf] %vm2422_vm2, %v3118_v12  ;;  %v1835_v17 = vmax.f32 %v1483_v13, 0.0  ;;  %v1899_v18 = vmax.f32 %v1739_v14, 0.0 }
 0x1d9   : > { %v1487_v19 = vpop.f32.mrf.mxu0  ;;  %v1743_v20 = vpop.f32.mrf.mxu1 }
 0x1da   : > { %v3055_v21 = vpack.c.bf16 %v1835_v17, %v1835_v17  ;;  %v3119_v22 = vpack.c.bf16 %v1899_v18, %v1899_v18  ;;  %v1488_v23 = vadd.f32 %v3941_v32, %v1487_v19  ;;  %v1744_v24 = vadd.f32 %v3941_v32, %v1743_v20 }
 0x1db   : > { %v1489_v25 = vpop.f32.mrf.mxu0  ;;  %v1745_v26 = vpop.f32.mrf.mxu1 }
 0x1dc   : > { %2476 = vst.msk [vmem:[%s3678_s20 + $0xd4] sm:$0xf] %vm2422_vm2, %v3055_v21  ;;  %2540 = vst.msk [vmem:[%s3678_s20 + $0x1d4] sm:$0xf] %vm2422_vm2, %v3119_v22  ;;  %v1836_v27 = vmax.f32 %v1488_v23, 0.0  ;;  %v1900_v28 = vmax.f32 %v1744_v24, 0.0 }
 0x1dd   : > { %v1490_v29 = vpop.f32.mrf.mxu0  ;;  %v1746_v30 = vpop.f32.mrf.mxu1 }
 0x1de   : > { %v3056_v31 = vpack.c.bf16 %v1836_v27, %v1836_v27  ;;  %v3120_v57 = vpack.c.bf16 %v1900_v28, %v1900_v28  ;;  %v1491_v33 = vadd.f32 %v3941_v32, %v1490_v29  ;;  %v1747_v34 = vadd.f32 %v3941_v32, %v1746_v30 }
 0x1df   : > { %v1492_v35 = vpop.f32.mrf.mxu0  ;;  %v1748_v36 = vpop.f32.mrf.mxu1 }
 0x1e0   : > { %2477 = vst.msk [vmem:[%s3678_s20 + $0xd8] sm:$0xf] %vm2422_vm2, %v3056_v31  ;;  %2541 = vst.msk [vmem:[%s3678_s20 + $0x1d8] sm:$0xf] %vm2422_vm2, %v3120_v57  ;;  %v1837_v37 = vmax.f32 %v1491_v33, 0.0  ;;  %v1901_v38 = vmax.f32 %v1747_v34, 0.0 }
 0x1e1   : > { %v1495_v39 = vpop.f32.mrf.mxu0  ;;  %v1751_v40 = vpop.f32.mrf.mxu1 }
 0x1e2   : > { %v3057_v41 = vpack.c.bf16 %v1837_v37, %v1837_v37  ;;  %v3121_v42 = vpack.c.bf16 %v1901_v38, %v1901_v38  ;;  %v1496_v43 = vadd.f32 %v3941_v32, %v1495_v39  ;;  %v1752_v44 = vadd.f32 %v3941_v32, %v1751_v40 }
 0x1e3   : > { %v1497_v45 = vpop.f32.mrf.mxu0  ;;  %v1753_v46 = vpop.f32.mrf.mxu1 }
 0x1e4   : > { %2478 = vst.msk [vmem:[%s3678_s20 + $0xdc] sm:$0xf] %vm2422_vm2, %v3057_v41  ;;  %2542 = vst.msk [vmem:[%s3678_s20 + $0x1dc] sm:$0xf] %vm2422_vm2, %v3121_v42  ;;  %v1838_v47 = vmax.f32 %v1496_v43, 0.0  ;;  %v1902_v48 = vmax.f32 %v1752_v44, 0.0 }
 0x1e5   : > { %v1498_v49 = vpop.f32.mrf.mxu0  ;;  %v1754_v50 = vpop.f32.mrf.mxu1 }
 0x1e6   : > { %v3058_v51 = vpack.c.bf16 %v1838_v47, %v1838_v47  ;;  %v3122_v52 = vpack.c.bf16 %v1902_v48, %v1902_v48  ;;  %v1499_v53 = vadd.f32 %v3941_v32, %v1498_v49  ;;  %v1755_v54 = vadd.f32 %v3941_v32, %v1754_v50 }
 0x1e7   : > { %v1500_v55 = vpop.f32.mrf.mxu0  ;;  %v1756_v56 = vpop.f32.mrf.mxu1 }
 0x1e8   : > { %2479 = vst.msk [vmem:[%s3678_s20 + $0xe0] sm:$0xf] %vm2422_vm2, %v3058_v51  ;;  %2543 = vst.msk [vmem:[%s3678_s20 + $0x1e0] sm:$0xf] %vm2422_vm2, %v3122_v52  ;;  %v1839_v58 = vmax.f32 %v1499_v53, 0.0  ;;  %v1903_v59 = vmax.f32 %v1755_v54, 0.0 }
 0x1e9   : > { %v1503_v60 = vpop.f32.mrf.mxu0  ;;  %v1759_v61 = vpop.f32.mrf.mxu1 }
 0x1ea   : > { %v3059_v62 = vpack.c.bf16 %v1839_v58, %v1839_v58  ;;  %v3123_v63 = vpack.c.bf16 %v1903_v59, %v1903_v59  ;;  %v1504_v0 = vadd.f32 %v3941_v32, %v1503_v60  ;;  %v1760_v1 = vadd.f32 %v3941_v32, %v1759_v61 }
 0x1eb   : > { %v1505_v2 = vpop.f32.mrf.mxu0  ;;  %v1761_v3 = vpop.f32.mrf.mxu1 }
 0x1ec   : > { %2480 = vst.msk [vmem:[%s3678_s20 + $0xe4] sm:$0xf] %vm2422_vm2, %v3059_v62  ;;  %2544 = vst.msk [vmem:[%s3678_s20 + $0x1e4] sm:$0xf] %vm2422_vm2, %v3123_v63  ;;  %v1840_v4 = vmax.f32 %v1504_v0, 0.0  ;;  %v1904_v5 = vmax.f32 %v1760_v1, 0.0 }
 0x1ed   : > { %v1506_v6 = vpop.f32.mrf.mxu0  ;;  %v1762_v7 = vpop.f32.mrf.mxu1 }
 0x1ee   : > { %v3060_v8 = vpack.c.bf16 %v1840_v4, %v1840_v4  ;;  %v3124_v9 = vpack.c.bf16 %v1904_v5, %v1904_v5  ;;  %v1507_v10 = vadd.f32 %v3941_v32, %v1506_v6  ;;  %v1763_v11 = vadd.f32 %v3941_v32, %v1762_v7 }
 0x1ef   : > { %v1508_v12 = vpop.f32.mrf.mxu0  ;;  %v1764_v13 = vpop.f32.mrf.mxu1 }
 0x1f0   : > { %2481 = vst.msk [vmem:[%s3678_s20 + $0xe8] sm:$0xf] %vm2422_vm2, %v3060_v8  ;;  %2545 = vst.msk [vmem:[%s3678_s20 + $0x1e8] sm:$0xf] %vm2422_vm2, %v3124_v9  ;;  %v1841_v14 = vmax.f32 %v1507_v10, 0.0  ;;  %v1905_v15 = vmax.f32 %v1763_v11, 0.0 }
 0x1f1   : > { %v1511_v16 = vpop.f32.mrf.mxu0  ;;  %v1767_v17 = vpop.f32.mrf.mxu1 }
 0x1f2   : > { %v3061_v18 = vpack.c.bf16 %v1841_v14, %v1841_v14  ;;  %v3125_v19 = vpack.c.bf16 %v1905_v15, %v1905_v15  ;;  %v1512_v20 = vadd.f32 %v3941_v32, %v1511_v16  ;;  %v1768_v21 = vadd.f32 %v3941_v32, %v1767_v17 }
 0x1f3   : > { %v1513_v22 = vpop.f32.mrf.mxu0  ;;  %v1769_v23 = vpop.f32.mrf.mxu1 }
 0x1f4   : > { %2482 = vst.msk [vmem:[%s3678_s20 + $0xec] sm:$0xf] %vm2422_vm2, %v3061_v18  ;;  %2546 = vst.msk [vmem:[%s3678_s20 + $0x1ec] sm:$0xf] %vm2422_vm2, %v3125_v19  ;;  %v1842_v24 = vmax.f32 %v1512_v20, 0.0  ;;  %v1906_v25 = vmax.f32 %v1768_v21, 0.0 }
 0x1f5   : > { %v1514_v26 = vpop.f32.mrf.mxu0  ;;  %v1770_v27 = vpop.f32.mrf.mxu1 }
 0x1f6   : > { %v3062_v28 = vpack.c.bf16 %v1842_v24, %v1842_v24  ;;  %v3126_v29 = vpack.c.bf16 %v1906_v25, %v1906_v25  ;;  %v1515_v30 = vadd.f32 %v3941_v32, %v1514_v26  ;;  %v1771_v31 = vadd.f32 %v3941_v32, %v1770_v27 }
 0x1f7   : > { %v1516_v57 = vpop.f32.mrf.mxu0  ;;  %v1772_v33 = vpop.f32.mrf.mxu1 }
 0x1f8   : > { %2483 = vst.msk [vmem:[%s3678_s20 + $0xf0] sm:$0xf] %vm2422_vm2, %v3062_v28  ;;  %2547 = vst.msk [vmem:[%s3678_s20 + $0x1f0] sm:$0xf] %vm2422_vm2, %v3126_v29  ;;  %v1843_v34 = vmax.f32 %v1515_v30, 0.0  ;;  %v1907_v35 = vmax.f32 %v1771_v31, 0.0 }
 0x1f9   : > { %v1519_v36 = vpop.f32.mrf.mxu0  ;;  %v1775_v37 = vpop.f32.mrf.mxu1 }
 0x1fa   : > { %v3063_v38 = vpack.c.bf16 %v1843_v34, %v1843_v34  ;;  %v3127_v39 = vpack.c.bf16 %v1907_v35, %v1907_v35  ;;  %v1520_v40 = vadd.f32 %v3941_v32, %v1519_v36  ;;  %v1776_v41 = vadd.f32 %v3941_v32, %v1775_v37 }
 0x1fb   : > { %v1521_v42 = vpop.f32.mrf.mxu0  ;;  %v1777_v43 = vpop.f32.mrf.mxu1 }
 0x1fc   : > { %2484 = vst.msk [vmem:[%s3678_s20 + $0xf4] sm:$0xf] %vm2422_vm2, %v3063_v38  ;;  %2548 = vst.msk [vmem:[%s3678_s20 + $0x1f4] sm:$0xf] %vm2422_vm2, %v3127_v39  ;;  %v1844_v44 = vmax.f32 %v1520_v40, 0.0  ;;  %v1908_v45 = vmax.f32 %v1776_v41, 0.0 }
 0x1fd   : > { %v1522_v46 = vpop.f32.mrf.mxu0  ;;  %v1778_v47 = vpop.f32.mrf.mxu1 }
 0x1fe   : > { %v3064_v48 = vpack.c.bf16 %v1844_v44, %v1844_v44  ;;  %v3128_v49 = vpack.c.bf16 %v1908_v45, %v1908_v45  ;;  %v1523_v50 = vadd.f32 %v3941_v32, %v1522_v46  ;;  %v1779_v51 = vadd.f32 %v3941_v32, %v1778_v47 }
 0x1ff   : > { %v1524_v52 = vpop.f32.mrf.mxu0  ;;  %v1780_v53 = vpop.f32.mrf.mxu1 }
 0x200   : > { %2485 = vst.msk [vmem:[%s3678_s20 + $0xf8] sm:$0xf] %vm2422_vm2, %v3064_v48  ;;  %2549 = vst.msk [vmem:[%s3678_s20 + $0x1f8] sm:$0xf] %vm2422_vm2, %v3128_v49  ;;  %v1845_v54 = vmax.f32 %v1523_v50, 0.0  ;;  %v1909_v55 = vmax.f32 %v1779_v51, 0.0 }
 0x202   : > { %v3065_v56 = vpack.c.bf16 %v1845_v54, %v1845_v54  ;;  %v3129_v58 = vpack.c.bf16 %v1909_v55, %v1909_v55 }
 0x204   : > { %2486 = vst.msk [vmem:[%s3678_s20 + $0xfc] sm:$0xf] %vm2422_vm2, %v3065_v56  ;;  %2550 = vst.msk [vmem:[%s3678_s20 + $0x1fc] sm:$0xf] %vm2422_vm2, %v3129_v58 }
 0x205 PF: > { %s13_s14 = sadd.s32 1, %s3393_s14   ;;  %s4128_s12 = smov %s3389_s13 }
 0x206   : > { %p10_p5 = scmp.ge.s32.totalorder %s13_s14, 4   ;;  %s4129_s13 = smov %s4131_s15 }
 0x208   :  { %12 = sbr.rel (!%p10_p5) target bundleno = 2 (0x2), region = 68 }

</bundles_post_ra>
